<compile_context>
chip_gen: v6e
topology: v6e:2x2x1
jax: 0.10.0
libtpu: 0.0.40
codegen_flags: <defaults>
</compile_context>

<pallas_src>
import functools

import jax
import jax.numpy as jnp
from jax.experimental import pallas as pl
from jax.experimental.pallas import tpu as pltpu


def pos_update_kernel(xn_ref, xe_ref, ex_ref,
                      w1_ref, w2_ref, wc_ref, wi1_ref, vec_ref,
                      out_ref, *, ND, ED, HD, GH):
    f32 = jnp.float32
    bf16 = jnp.bfloat16

    xn = xn_ref[...]                      # (TM, 2*ND) bf16  [h_node[left] | h_node[right]]
    xe = xe_ref[...]                      # (TM, ED)   bf16  h_edge
    ex = ex_ref[...].astype(f32)          # (TM, 5)    f32   [time, dist, rvec_x, rvec_y, rvec_z]

    vecs = vec_ref[...]                   # (8, VW) f32 packed biases / row-weights
    b1 = vecs[0:1, :2 * HD]
    b2 = vecs[1:2, :2 * ED]
    bi1 = vecs[2:3, :ND]
    bg1 = vecs[3:4, :GH]
    wgt_row = vecs[4:5, :GH]
    wi2_row = vecs[5:6, :ND]
    wg2_row = vecs[6:7, :GH]
    bi2 = vecs[7:8, 0:1]
    bg2 = vecs[7:8, 1:2]

    # left/right node MLPs, fused as block-diagonal matmuls.
    h1 = jnp.dot(xn, w1_ref[...], preferred_element_type=f32) + b1        # (TM, 2*HD)
    h1 = jnp.maximum(h1, 0.0)
    lr = jnp.dot(h1.astype(bf16), w2_ref[...], preferred_element_type=f32) + b2  # (TM, 2*ED)
    p = lr[:, :ED] * lr[:, ED:2 * ED]     # left_feat * right_feat  (TM, ED) f32

    # BondFFN stage 1: [bond_feat | node_feat | gate_pre] in a single matmul.
    xc = jnp.concatenate([xe, p.astype(bf16)], axis=-1)                   # (TM, 2*ED)
    s1 = jnp.dot(xc, wc_ref[...], preferred_element_type=f32)             # (TM, 2*ND+GH)
    bond_feat = s1[:, :ND]
    node_feat = s1[:, ND:2 * ND]
    gate_pre = s1[:, 2 * ND:2 * ND + GH]

    # inter_module MLP (second layer is a VPU row-mul + lane reduce, N=1 is too
    # skinny for the MXU).
    inter = bond_feat * node_feat
    hi = jnp.dot(inter.astype(bf16), wi1_ref[...], preferred_element_type=f32) + bi1
    hi = jnp.maximum(hi, 0.0)
    y = jnp.sum(hi * wi2_row, axis=-1, keepdims=True) + bi2               # (TM, 1)

    # gate MLP: time contribution is a rank-1 VPU broadcast.
    t = ex[:, 0:1]
    gh = jnp.maximum(gate_pre + t * wgt_row + bg1, 0.0)
    g = jnp.sum(gh * wg2_row, axis=-1, keepdims=True) + bg2               # (TM, 1)

    w_edge = y * jax.nn.sigmoid(g)                                        # (TM, 1)

    dist = ex[:, 1:2]
    rvec = ex[:, 2:5]
    # Folded denominator: ONE divide on a (TM, 1) column, then a (TM, 3) mul.
    denom = dist * (dist + 1.0)
    scaled = w_edge / denom
    out_ref[...] = (scaled * rvec).astype(out_ref.dtype)


def pack_params(p, ND, ED, HD, GH):
    """Pack PyTorch-layout weights into fused bf16 matmul slabs + one f32 vector slab."""
    bf16, f32 = jnp.bfloat16, jnp.float32

    def blockdiag(a, b):
        za = jnp.zeros((a.shape[0], b.shape[1]), f32)
        zb = jnp.zeros((b.shape[0], a.shape[1]), f32)
        return jnp.concatenate([jnp.concatenate([a, za], axis=1),
                                jnp.concatenate([zb, b], axis=1)], axis=0)

    w1 = blockdiag(p["wl1"], p["wr1"]).astype(bf16)            # (2*ND, 2*HD)
    w2 = blockdiag(p["wl2"], p["wr2"]).astype(bf16)            # (2*HD, 2*ED)

    wg_e = p["wg1"][:ED]
    wg_p = p["wg1"][ED:2 * ED]
    wg_t = p["wg1"][2 * ED]                                    # (GH,)
    z = jnp.zeros((ED, ND), f32)
    wc = jnp.concatenate([
        jnp.concatenate([p["wb"], z, wg_e], axis=1),
        jnp.concatenate([z, p["wn"], wg_p], axis=1)], axis=0).astype(bf16)  # (2*ED, 2*ND+GH)

    wi1 = p["wi1"].astype(bf16)                                # (ND, ND)

    vw = max(2 * HD, 2 * ED, ND, GH, 2)
    vw = ((vw + 127) // 128) * 128
    vecs = jnp.zeros((8, vw), f32)
    vecs = vecs.at[0, :2 * HD].set(jnp.concatenate([p["bl1"], p["br1"]]))
    vecs = vecs.at[1, :2 * ED].set(jnp.concatenate([p["bl2"], p["br2"]]))
    vecs = vecs.at[2, :ND].set(p["bi1"])
    vecs = vecs.at[3, :GH].set(p["bg1"])
    vecs = vecs.at[4, :GH].set(wg_t)
    vecs = vecs.at[5, :ND].set(p["wi2"][:, 0])
    vecs = vecs.at[6, :GH].set(p["wg2"][:, 0])
    vecs = vecs.at[7, 0].set(p["bi2"][0])
    vecs = vecs.at[7, 1].set(p["bg2"][0])
    return {"w1": w1, "w2": w2, "wc": wc, "wi1": wi1, "vecs": vecs}


def pos_update_pallas(h_node, h_edge, edge_index, relative_vec, distance, edge_time,
                      params, *, tm=512):
    f32, bf16 = jnp.float32, jnp.bfloat16
    n_nodes, ND = h_node.shape
    E, ED = h_edge.shape
    HD = params["wl1"].shape[1]
    GH = params["bg1"].shape[0]

    # Tile policy: big tiles (amortize per-step overhead) but keep >=4 grid
    # steps so both v7x TensorCores get pipelined work; multiple of 128 rows
    # so blocks stay sublane-aligned.
    tm = max(128, (tm // 128) * 128)
    tm_eff = min(tm, max(128, ((E + 4 * 128 - 1) // (4 * 128)) * 128))
    e_pad = ((E + tm_eff - 1) // tm_eff) * tm_eff
    pad = e_pad - E

    il_orig = edge_index[0]
    # Pad only the SMALL per-edge arrays (indices / geometry / h_edge) up front;
    # the big gathered slab is then produced directly at e_pad rows.
    if pad:
        il = jnp.pad(edge_index[0], (0, pad))                              # index 0 (valid)
        ir = jnp.pad(edge_index[1], (0, pad))
        rvec = jnp.pad(relative_vec, ((0, pad), (0, 0)))
        dist = jnp.pad(distance, (0, pad), constant_values=1.0)            # avoid /0 in tail
        et = jnp.pad(edge_time, ((0, pad), (0, 0)))
        he = jnp.pad(h_edge, ((0, pad), (0, 0)))
    else:
        il, ir = edge_index[0], edge_index[1]
        rvec, dist, et, he = relative_vec, distance, edge_time, h_edge

    # TODO(synk): row gather of node features stays in XLA (data-dependent indexing);
    # an in-kernel gather (h_node resident in VMEM + scalar-prefetched indices) is a
    # possible follow-up when n_nodes*ND fits VMEM alongside the tile buffers.
    h_node_bf = h_node.astype(bf16)                                        # cast once, gather bf16
    x_nodes = jnp.concatenate([jnp.take(h_node_bf, il, axis=0),
                               jnp.take(h_node_bf, ir, axis=0)], axis=-1)  # (e_pad, 2*ND) bf16
    xe = he.astype(bf16)                                                   # (e_pad, ED) bf16
    extras = jnp.concatenate([et.astype(f32),
                              dist[:, None].astype(f32),
                              rvec.astype(f32)], axis=-1)                  # (e_pad, 5) f32

    packed = pack_params(params, ND, ED, HD, GH)

    def full_spec(arr):
        shp = arr.shape
        return pl.BlockSpec(shp, lambda i: (0,) * len(shp))

    grid = (e_pad // tm_eff,)
    kernel = functools.partial(pos_update_kernel, ND=ND, ED=ED, HD=HD, GH=GH)

    # Advisory cost estimate so XLA can overlap the wrapper gather/scatter fusions.
    flops_per_edge = (2 * (2 * ND) * (2 * HD)            # node MLPs layer 1 (blockdiag)
                      + 2 * (2 * HD) * (2 * ED)          # node MLPs layer 2
                      + 2 * (2 * ED) * (2 * ND + GH)     # packed BondFFN stage 1
                      + 2 * ND * ND                      # inter_module layer 1
                      + 6 * ND + 6 * GH + 32)            # VPU heads / elementwise (rough)
    bytes_per_edge = 2 * ND * 2 + ED * 2 + 5 * 4 + 3 * 4
    weight_bytes = sum(int(v.size) * v.dtype.itemsize for v in packed.values())
    cost = pl.CostEstimate(flops=e_pad * flops_per_edge,
                           transcendentals=2 * e_pad,
                           bytes_accessed=e_pad * bytes_per_edge + weight_bytes)

    force = pl.pallas_call(
        kernel,
        out_shape=jax.ShapeDtypeStruct((e_pad, 3), f32),
        grid_spec=pltpu.PrefetchScalarGridSpec(
            num_scalar_prefetch=0,
            grid=grid,
            in_specs=[
                pl.BlockSpec((tm_eff, 2 * ND), lambda i: (i, 0)),
                pl.BlockSpec((tm_eff, ED), lambda i: (i, 0)),
                pl.BlockSpec((tm_eff, 5), lambda i: (i, 0)),
                full_spec(packed["w1"]),
                full_spec(packed["w2"]),
                full_spec(packed["wc"]),
                full_spec(packed["wi1"]),
                full_spec(packed["vecs"]),
            ],
            out_specs=pl.BlockSpec((tm_eff, 3), lambda i: (i, 0)),
        ),
        compiler_params=pltpu.CompilerParams(
            dimension_semantics=("parallel",)),
        cost_estimate=cost,
    )(x_nodes, xe, extras,
      packed["w1"], packed["w2"], packed["wc"], packed["wi1"], packed["vecs"])

    force = force[:E]  # drop padded tail BEFORE the scatter (keep this invariant)
    # TODO(synk): scatter_sum over edge_index_left stays in XLA (data-dependent scatter-add).
    return jnp.zeros((n_nodes, 3), f32).at[il_orig].add(force)


def pos_update_reference(h_node, h_edge, edge_index, relative_vec, distance, edge_time, p):
    """Pure-JAX reference mirroring the PyTorch forward (same bf16 cast points as the kernel)."""
    bf16, f32 = jnp.bfloat16, jnp.float32
    il, ir = edge_index[0], edge_index[1]
    ED = h_edge.shape[1]

    def mlp(x, w1, b1, w2, b2):
        h = jnp.dot(x.astype(bf16), w1.astype(bf16), preferred_element_type=f32) + b1
        h = jnp.maximum(h, 0.0)
        return jnp.dot(h.astype(bf16), w2.astype(bf16), preferred_element_type=f32) + b2

    left = mlp(h_node[il], p["wl1"], p["bl1"], p["wl2"], p["bl2"])
    right = mlp(h_node[ir], p["wr1"], p["br1"], p["wr2"], p["br2"])
    pn = left * right

    xe = h_edge.astype(bf16)
    pb = pn.astype(bf16)
    bond_feat = jnp.dot(xe, p["wb"].astype(bf16), preferred_element_type=f32)
    node_feat = jnp.dot(pb, p["wn"].astype(bf16), preferred_element_type=f32)
    inter = bond_feat * node_feat
    hi = jnp.maximum(jnp.dot(inter.astype(bf16), p["wi1"].astype(bf16),
                             preferred_element_type=f32) + p["bi1"], 0.0)
    y = jnp.sum(hi * p["wi2"][:, 0][None, :], axis=-1, keepdims=True) + p["bi2"]

    wg_e, wg_p, wg_t = p["wg1"][:ED], p["wg1"][ED:2 * ED], p["wg1"][2 * ED]
    gate_pre = (jnp.dot(xe, wg_e.astype(bf16), preferred_element_type=f32)
                + jnp.dot(pb, wg_p.astype(bf16), preferred_element_type=f32))
    gh = jnp.maximum(gate_pre + edge_time * wg_t[None, :] + p["bg1"], 0.0)
    g = jnp.sum(gh * p["wg2"][:, 0][None, :], axis=-1, keepdims=True) + p["bg2"]

    w_edge = y * jax.nn.sigmoid(g)
    d = distance[:, None]
    force = w_edge * relative_vec / d / (d + 1.0)
    return jnp.zeros((h_node.shape[0], 3), f32).at[il].add(force)


def make_params(key, node_dim, edge_dim, hidden_dim, gate_hidden=32):
    ND, ED, HD, GH = node_dim, edge_dim, hidden_dim, gate_hidden
    ks = jax.random.split(key, 18)
    s = 0.1

    def w(k, shape):
        return s * jax.random.normal(k, shape, jnp.float32)

    return {
        # left_lin_edge / right_lin_edge: MLP(node_dim -> hidden_dim -> edge_dim)
        "wl1": w(ks[0], (ND, HD)), "bl1": w(ks[1], (HD,)),
        "wl2": w(ks[2], (HD, ED)), "bl2": w(ks[3], (ED,)),
        "wr1": w(ks[4], (ND, HD)), "br1": w(ks[5], (HD,)),
        "wr2": w(ks[6], (HD, ED)), "br2": w(ks[7], (ED,)),
        # edge_lin = BondFFN(edge_dim, edge_dim, node_dim, use_gate=True, out_dim=1)
        "wb": w(ks[8], (ED, ND)),                      # bond_linear (no bias)
        "wn": w(ks[9], (ED, ND)),                      # node_linear (no bias)
        "wi1": w(ks[10], (ND, ND)), "bi1": w(ks[11], (ND,)),
        "wi2": w(ks[12], (ND, 1)), "bi2": w(ks[13], (1,)),
        "wg1": w(ks[14], (2 * ED + 1, GH)), "bg1": w(ks[15], (GH,)),
        "wg2": w(ks[16], (GH, 1)), "bg2": w(ks[17], (1,)),
    }


if __name__ == "__main__":
    ND, ED, HD = 64, 32, 64            # node_dim, edge_dim, hidden_dim
    N_NODES, N_EDGES = 128, 512

    key = jax.random.PRNGKey(0)
    k1, k2, k3, k4, k5, k6, kp = jax.random.split(key, 7)
    h_node = jax.random.normal(k1, (N_NODES, ND), jnp.float32)
    h_edge = jax.random.normal(k2, (N_EDGES, ED), jnp.float32)
    edge_index = jax.random.randint(k3, (2, N_EDGES), 0, N_NODES)
    relative_vec = jax.random.normal(k4, (N_EDGES, 3), jnp.float32)
    distance = jax.random.uniform(k5, (N_EDGES,), jnp.float32, 0.5, 2.0)
    edge_time = jax.random.uniform(k6, (N_EDGES, 1), jnp.float32)
    params = make_params(kp, ND, ED, HD)

    out = pos_update_pallas(h_node, h_edge, edge_index, relative_vec, distance,
                            edge_time, params, tm=512)
    out = jax.block_until_ready(out)

    ref = pos_update_reference(h_node, h_edge, edge_index, relative_vec, distance,
                               edge_time, params)
    assert out.shape == (N_NODES, 3)
    err = jnp.max(jnp.abs(out - ref))
    assert jnp.allclose(out, ref, atol=1e-3, rtol=1e-3), f"mismatch vs reference: {err}"
    print("KERNEL_OK")
</pallas_src>

<mosaic_0001>
module attributes {stable_mosaic.version = 11 : i64} {
  func.func @pos_update_kernel(%arg0: i32, %arg1: memref<128x128xbf16, #tpu.memory_space<vmem>>, %arg2: memref<128x32xbf16, #tpu.memory_space<vmem>>, %arg3: memref<128x5xf32, #tpu.memory_space<vmem>>, %arg4: memref<128x128xbf16, #tpu.memory_space<vmem>>, %arg5: memref<128x64xbf16, #tpu.memory_space<vmem>>, %arg6: memref<64x160xbf16, #tpu.memory_space<vmem>>, %arg7: memref<64x64xbf16, #tpu.memory_space<vmem>>, %arg8: memref<8x128xf32, #tpu.memory_space<vmem>>, %arg9: memref<128x3xf32, #tpu.memory_space<vmem>>) attributes {dimension_semantics = [#tpu.dimension_semantics<parallel>], iteration_bounds = array<i64: 4>, scalar_prefetch = 0 : i64, scratch_operands = 0 : i64, tpu.core_type = #tpu.core_type<tc>, window_params = [{transform_indices = @transform_0, window_bounds = array<i64: 128, 128>}, {transform_indices = @transform_1, window_bounds = array<i64: 128, 32>}, {transform_indices = @transform_2, window_bounds = array<i64: 128, 5>}, {pipeline_mode = #tpu.pipeline_mode<synchronous>, transform_indices = @transform_3, window_bounds = array<i64: 128, 128>}, {pipeline_mode = #tpu.pipeline_mode<synchronous>, transform_indices = @transform_4, window_bounds = array<i64: 128, 64>}, {pipeline_mode = #tpu.pipeline_mode<synchronous>, transform_indices = @transform_5, window_bounds = array<i64: 64, 160>}, {pipeline_mode = #tpu.pipeline_mode<synchronous>, transform_indices = @transform_6, window_bounds = array<i64: 64, 64>}, {pipeline_mode = #tpu.pipeline_mode<synchronous>, transform_indices = @transform_7, window_bounds = array<i64: 8, 128>}, {transform_indices = @transform_8, window_bounds = array<i64: 128, 3>}]} {
    %c0 = arith.constant 0 : index
    %c0_0 = arith.constant 0 : index
    %0 = vector.load %arg1[%c0, %c0_0] : memref<128x128xbf16, #tpu.memory_space<vmem>>, vector<128x128xbf16>
    %c0_1 = arith.constant 0 : index
    %c0_2 = arith.constant 0 : index
    %1 = vector.load %arg2[%c0_1, %c0_2] : memref<128x32xbf16, #tpu.memory_space<vmem>>, vector<128x32xbf16>
    %c0_3 = arith.constant 0 : index
    %c0_4 = arith.constant 0 : index
    %2 = vector.load %arg3[%c0_3, %c0_4] : memref<128x5xf32, #tpu.memory_space<vmem>>, vector<128x5xf32>
    %c0_5 = arith.constant 0 : index
    %c0_6 = arith.constant 0 : index
    %3 = vector.load %arg8[%c0_5, %c0_6] : memref<8x128xf32, #tpu.memory_space<vmem>>, vector<8x128xf32>
    %4 = vector.extract_strided_slice %3 {offsets = [0, 0], sizes = [1, 128], strides = [1, 1]} : vector<8x128xf32> to vector<1x128xf32>
    %5 = vector.extract_strided_slice %3 {offsets = [1, 0], sizes = [1, 64], strides = [1, 1]} : vector<8x128xf32> to vector<1x64xf32>
    %6 = vector.extract_strided_slice %3 {offsets = [2, 0], sizes = [1, 64], strides = [1, 1]} : vector<8x128xf32> to vector<1x64xf32>
    %7 = vector.extract_strided_slice %3 {offsets = [3, 0], sizes = [1, 32], strides = [1, 1]} : vector<8x128xf32> to vector<1x32xf32>
    %8 = vector.extract_strided_slice %3 {offsets = [4, 0], sizes = [1, 32], strides = [1, 1]} : vector<8x128xf32> to vector<1x32xf32>
    %9 = vector.extract_strided_slice %3 {offsets = [5, 0], sizes = [1, 64], strides = [1, 1]} : vector<8x128xf32> to vector<1x64xf32>
    %10 = vector.extract_strided_slice %3 {offsets = [6, 0], sizes = [1, 32], strides = [1, 1]} : vector<8x128xf32> to vector<1x32xf32>
    %11 = vector.extract_strided_slice %3 {offsets = [7, 0], sizes = [1, 1], strides = [1, 1]} : vector<8x128xf32> to vector<1x1xf32>
    %12 = vector.extract_strided_slice %3 {offsets = [7, 1], sizes = [1, 1], strides = [1, 1]} : vector<8x128xf32> to vector<1x1xf32>
    %c0_7 = arith.constant 0 : index
    %c0_8 = arith.constant 0 : index
    %13 = vector.load %arg4[%c0_7, %c0_8] : memref<128x128xbf16, #tpu.memory_space<vmem>>, vector<128x128xbf16>
    %cst = arith.constant dense<0.000000e+00> : vector<128x128xf32>
    %14 = tpu.matmul %0, %13, %cst {dimension_numbers = #tpu.dot_dimension_numbers<[1], [0], [0], [1], [0, 0, 1, 1], [], []>} : vector<128x128xbf16>, vector<128x128xbf16>, vector<128x128xf32> -> vector<128x128xf32>
    %15 = vector.broadcast %4 : vector<1x128xf32> to vector<128x128xf32>
    %16 = arith.addf %14, %15 : vector<128x128xf32>
    %cst_9 = arith.constant 0.000000e+00 : f32
    %17 = vector.broadcast %cst_9 : f32 to vector<128x128xf32>
    %18 = arith.maximumf %16, %17 : vector<128x128xf32>
    %19 = arith.truncf %18 : vector<128x128xf32> to vector<128x128xbf16>
    %c0_10 = arith.constant 0 : index
    %c0_11 = arith.constant 0 : index
    %20 = vector.load %arg5[%c0_10, %c0_11] : memref<128x64xbf16, #tpu.memory_space<vmem>>, vector<128x64xbf16>
    %cst_12 = arith.constant dense<0.000000e+00> : vector<128x64xf32>
    %21 = tpu.matmul %19, %20, %cst_12 {dimension_numbers = #tpu.dot_dimension_numbers<[1], [0], [0], [1], [0, 0, 1, 1], [], []>} : vector<128x128xbf16>, vector<128x64xbf16>, vector<128x64xf32> -> vector<128x64xf32>
    %22 = vector.broadcast %5 : vector<1x64xf32> to vector<128x64xf32>
    %23 = arith.addf %21, %22 : vector<128x64xf32>
    %24 = vector.extract_strided_slice %23 {offsets = [0, 0], sizes = [128, 32], strides = [1, 1]} : vector<128x64xf32> to vector<128x32xf32>
    %25 = vector.extract_strided_slice %23 {offsets = [0, 32], sizes = [128, 32], strides = [1, 1]} : vector<128x64xf32> to vector<128x32xf32>
    %26 = arith.mulf %24, %25 : vector<128x32xf32>
    %27 = arith.truncf %26 : vector<128x32xf32> to vector<128x32xbf16>
    %28 = tpu.concatenate %1, %27 in 1 : vector<128x32xbf16>, vector<128x32xbf16> -> vector<128x64xbf16>
    %c0_13 = arith.constant 0 : index
    %c0_14 = arith.constant 0 : index
    %29 = vector.load %arg6[%c0_13, %c0_14] : memref<64x160xbf16, #tpu.memory_space<vmem>>, vector<64x160xbf16>
    %cst_15 = arith.constant dense<0.000000e+00> : vector<128x160xf32>
    %30 = tpu.matmul %28, %29, %cst_15 {dimension_numbers = #tpu.dot_dimension_numbers<[1], [0], [0], [1], [0, 0, 1, 1], [], []>} : vector<128x64xbf16>, vector<64x160xbf16>, vector<128x160xf32> -> vector<128x160xf32>
    %31 = vector.extract_strided_slice %30 {offsets = [0, 0], sizes = [128, 64], strides = [1, 1]} : vector<128x160xf32> to vector<128x64xf32>
    %32 = vector.extract_strided_slice %30 {offsets = [0, 64], sizes = [128, 64], strides = [1, 1]} : vector<128x160xf32> to vector<128x64xf32>
    %33 = vector.extract_strided_slice %30 {offsets = [0, 128], sizes = [128, 32], strides = [1, 1]} : vector<128x160xf32> to vector<128x32xf32>
    %34 = arith.mulf %31, %32 : vector<128x64xf32>
    %35 = arith.truncf %34 : vector<128x64xf32> to vector<128x64xbf16>
    %c0_16 = arith.constant 0 : index
    %c0_17 = arith.constant 0 : index
    %36 = vector.load %arg7[%c0_16, %c0_17] : memref<64x64xbf16, #tpu.memory_space<vmem>>, vector<64x64xbf16>
    %cst_18 = arith.constant dense<0.000000e+00> : vector<128x64xf32>
    %37 = tpu.matmul %35, %36, %cst_18 {dimension_numbers = #tpu.dot_dimension_numbers<[1], [0], [0], [1], [0, 0, 1, 1], [], []>} : vector<128x64xbf16>, vector<64x64xbf16>, vector<128x64xf32> -> vector<128x64xf32>
    %38 = vector.broadcast %6 : vector<1x64xf32> to vector<128x64xf32>
    %39 = arith.addf %37, %38 : vector<128x64xf32>
    %cst_19 = arith.constant 0.000000e+00 : f32
    %40 = vector.broadcast %cst_19 : f32 to vector<128x64xf32>
    %41 = arith.maximumf %39, %40 : vector<128x64xf32>
    %42 = vector.broadcast %9 : vector<1x64xf32> to vector<128x64xf32>
    %43 = arith.mulf %41, %42 : vector<128x64xf32>
    %cst_20 = arith.constant dense<0.000000e+00> : vector<128xf32>
    %44 = vector.multi_reduction <add>, %43, %cst_20 [1] : vector<128x64xf32> to vector<128xf32>
    %45 = vector.shape_cast %44 : vector<128xf32> to vector<128x1xf32>
    %46 = vector.broadcast %11 : vector<1x1xf32> to vector<128x1xf32>
    %47 = arith.addf %45, %46 : vector<128x1xf32>
    %48 = vector.extract_strided_slice %2 {offsets = [0, 0], sizes = [128, 1], strides = [1, 1]} : vector<128x5xf32> to vector<128x1xf32>
    %49 = vector.broadcast %48 : vector<128x1xf32> to vector<128x32xf32>
    %50 = vector.broadcast %8 : vector<1x32xf32> to vector<128x32xf32>
    %51 = arith.mulf %49, %50 : vector<128x32xf32>
    %52 = arith.addf %33, %51 : vector<128x32xf32>
    %53 = vector.broadcast %7 : vector<1x32xf32> to vector<128x32xf32>
    %54 = arith.addf %52, %53 : vector<128x32xf32>
    %cst_21 = arith.constant 0.000000e+00 : f32
    %55 = vector.broadcast %cst_21 : f32 to vector<128x32xf32>
    %56 = arith.maximumf %54, %55 : vector<128x32xf32>
    %57 = vector.broadcast %10 : vector<1x32xf32> to vector<128x32xf32>
    %58 = arith.mulf %56, %57 : vector<128x32xf32>
    %cst_22 = arith.constant dense<0.000000e+00> : vector<128xf32>
    %59 = vector.multi_reduction <add>, %58, %cst_22 [1] : vector<128x32xf32> to vector<128xf32>
    %60 = vector.shape_cast %59 : vector<128xf32> to vector<128x1xf32>
    %61 = vector.broadcast %12 : vector<1x1xf32> to vector<128x1xf32>
    %62 = arith.addf %60, %61 : vector<128x1xf32>
    %63 = arith.negf %62 : vector<128x1xf32>
    %64 = math.exp %63 : vector<128x1xf32>
    %cst_23 = arith.constant 1.000000e+00 : f32
    %65 = vector.broadcast %cst_23 : f32 to vector<128x1xf32>
    %66 = arith.addf %65, %64 : vector<128x1xf32>
    %67 = arith.divf %65, %66 : vector<128x1xf32>
    %68 = arith.mulf %47, %67 : vector<128x1xf32>
    %69 = vector.extract_strided_slice %2 {offsets = [0, 1], sizes = [128, 1], strides = [1, 1]} : vector<128x5xf32> to vector<128x1xf32>
    %70 = vector.extract_strided_slice %2 {offsets = [0, 2], sizes = [128, 3], strides = [1, 1]} : vector<128x5xf32> to vector<128x3xf32>
    %cst_24 = arith.constant 1.000000e+00 : f32
    %71 = vector.broadcast %cst_24 : f32 to vector<128x1xf32>
    %72 = arith.addf %69, %71 : vector<128x1xf32>
    %73 = arith.mulf %69, %72 : vector<128x1xf32>
    %74 = arith.divf %68, %73 : vector<128x1xf32>
    %75 = vector.broadcast %74 : vector<128x1xf32> to vector<128x3xf32>
    %76 = arith.mulf %75, %70 : vector<128x3xf32>
    %c0_25 = arith.constant 0 : index
    %c0_26 = arith.constant 0 : index
    %77 = vector.load %arg9[%c0_25, %c0_26] : memref<128x3xf32, #tpu.memory_space<vmem>>, vector<128x3xf32>
    tpu.vector_store %arg9[%c0_25, %c0_26], %76 {strides = array<i32>} : memref<128x3xf32, #tpu.memory_space<vmem>>, vector<128x3xf32>,
    return
  }
  func.func @transform_0(%arg0: i32) -> (i32, i32) {
    %c0_i32 = arith.constant 0 : i32
    %c0_i32_0 = arith.constant 0 : i32
    return %arg0, %c0_i32 : i32, i32
  }
  func.func @transform_1(%arg0: i32) -> (i32, i32) {
    %c0_i32 = arith.constant 0 : i32
    %c0_i32_0 = arith.constant 0 : i32
    return %arg0, %c0_i32 : i32, i32
  }
  func.func @transform_2(%arg0: i32) -> (i32, i32) {
    %c0_i32 = arith.constant 0 : i32
    %c0_i32_0 = arith.constant 0 : i32
    return %arg0, %c0_i32 : i32, i32
  }
  func.func @transform_3(%arg0: i32) -> (i32, i32) {
    %c0_i32 = arith.constant 0 : i32
    %c0_i32_0 = arith.constant 0 : i32
    %c0_i32_1 = arith.constant 0 : i32
    return %c0_i32, %c0_i32_0 : i32, i32
  }
  func.func @transform_4(%arg0: i32) -> (i32, i32) {
    %c0_i32 = arith.constant 0 : i32
    %c0_i32_0 = arith.constant 0 : i32
    %c0_i32_1 = arith.constant 0 : i32
    return %c0_i32, %c0_i32_0 : i32, i32
  }
  func.func @transform_5(%arg0: i32) -> (i32, i32) {
    %c0_i32 = arith.constant 0 : i32
    %c0_i32_0 = arith.constant 0 : i32
    %c0_i32_1 = arith.constant 0 : i32
    return %c0_i32, %c0_i32_0 : i32, i32
  }
  func.func @transform_6(%arg0: i32) -> (i32, i32) {
    %c0_i32 = arith.constant 0 : i32
    %c0_i32_0 = arith.constant 0 : i32
    %c0_i32_1 = arith.constant 0 : i32
    return %c0_i32, %c0_i32_0 : i32, i32
  }
  func.func @transform_7(%arg0: i32) -> (i32, i32) {
    %c0_i32 = arith.constant 0 : i32
    %c0_i32_0 = arith.constant 0 : i32
    %c0_i32_1 = arith.constant 0 : i32
    return %c0_i32, %c0_i32_0 : i32, i32
  }
  func.func @transform_8(%arg0: i32) -> (i32, i32) {
    %c0_i32 = arith.constant 0 : i32
    %c0_i32_0 = arith.constant 0 : i32
    return %arg0, %c0_i32 : i32, i32
  }
}

</mosaic_0001>

<bundles_post_ra>
// kernel: tpu_custom_call.1
= control target key start
LH: loop header
LB: loop body
LE: loop exit
PB: predicated region body
PF: predicated region fallthrough
CT: control target
= control target key end

     0   :  { %s2772_s27 = smov 0   ;;  %s3672_s0 = inlined_call_operand.vmem [shape: bf16[512,128], index: 0, kind: input, shape index: {}]   ;;  %s3673_s1 = inlined_call_operand.vmem [shape: bf16[512,32], index: 1, kind: input, shape index: {}]   ;;  %s3674_s2 = inlined_call_operand.vmem [shape: f32[512,5], index: 2, kind: input, shape index: {}]   ;;  %s3675_s3 = inlined_call_operand.vmem [shape: bf16[128,128], index: 3, kind: input, shape index: {}]   ;;  %s3676_s4 = inlined_call_operand.vmem [shape: bf16[128,64], index: 4, kind: input, shape index: {}]   ;;  %s3677_s5 = inlined_call_operand.vmem [shape: bf16[64,160], index: 5, kind: input, shape index: {}]   ;;  %s3678_s6 = inlined_call_operand.vmem [shape: bf16[64,64], index: 6, kind: input, shape index: {}]   ;;  %s3679_s7 = inlined_call_operand.vmem [shape: f32[8,128], index: 7, kind: input, shape index: {}]   ;;  %s3680_s8 = inlined_call_operand.vmem [shape: f32[512,3], index: 8, kind: output, shape index: {}]  }
   0x1 LB: > { %s2306_s28 = sadd.s32 4294967295, %s2719_s27   ;;  %p2310_p0 = scmp.ge.s32.totalorder %s2719_s27, 1  ;;  %s2719_s27 = sphi %s2772_s27, %s18_s27  }
   0x2   : > { %p285_p1 = scmp.lt.s32.totalorder %s2719_s27, 5 }
   0x4   : > { %p286_p2 = pnand %p2310_p0, %p285_p1 }
   0x5   : > { %s2311_s9 = sshll.u32 (!%p286_p2), %s2306_s28, 4  ;;  %s2721_s30 = smov (!%p286_p2), 96  }
   0x6   : > { %289 = sbr.rel (%p286_p2) target bundleno = 2013 (0x7dd), region = 52  ;;  %p330_p3 = scmp.lt.s32.totalorder (!%p286_p2), %s2311_s9, 63 }
   0x7   : > { %s2724_s22 = smov (!%p286_p2), 64   ;;  %s2726_s25 = smov (!%p286_p2), 126  }
   0xb   : > { %v2553_v0 = vld [vmem:[%s3675_s3 + $0x38] sm:$0xff]   ;;  %v2554_v1 = vld [vmem:[%s3675_s3 + $0x30] sm:$0xff]   ;;  %s3682_s9 = smov (!%p330_p3, %s2311_s9), 63  ;;  %v2555_v2 = vld [vmem:[%s3675_s3 + $0x28] sm:$0xff]   ;;  %v419_v24 = vlaneseq  ;;  %vm1030_vm0 = vcmask 523264   ;;  %vm957_vm1 = vcmask 261120  }
   0xc   : > { %2441 = vmatprep.subr.bf16.mxu0 %v2553_v0  ;;  %s2312_s14 = sshll.u32 %s3682_s9, 2  ;;  %v2556_v3 = vld [vmem:[%s3675_s3 + $0x20] sm:$0xff]   ;;  %v2557_v5 = vld [vmem:[%s3675_s3 + $0x18] sm:$0xff]   ;;  %v2558_v6 = vld [vmem:[%s3675_s3 + $0x10] sm:$0xff]   ;;  %s2316_s29 = sshll.u32 %s3682_s9, 3  ;;  %vm2209_vm2 = vcmask 23552  }
   0xd   : > { %2442 = vmatpush3.bf16.msra.mxu0 %v2553_v0  ;;  %s2795_s17 = scalar_lea.vmem %s3672_s0, %s2312_s14  ;;  %v2569_v7 = vld [vmem:[%s3676_s4 + $0x38] sm:$0xff]   ;;  %v2570_v8 = vld [vmem:[%s3676_s4 + $0x30] sm:$0xff]   ;;  %v2559_v9 = vld [vmem:[%s3675_s3 + $0x8] sm:$0xff]   ;;  %s2828_s20 = scalar_lea.vmem %s3673_s1, %s2312_s14  ;;  %v2849_v25 = vshrl.u32 %v419_v24, 7 }
   0xe   : > { %2443 = vmatprep.subr.bf16.mxu0 %v2554_v1  ;;  %v2561_v4 = vld [vmem:[%s2795_s17] sm:$0xff]   ;;  %2473 = vmatprep.subr.bf16.mxu1 %v2569_v7  ;;  %v2571_v10 = vld [vmem:[%s3676_s4 + $0x28] sm:$0xff]   ;;  %v2573_v13 = vld [vmem:[%s3676_s4 + $0x18] sm:$0xff]   ;;  %s2982_s11 = scalar_lea.vmem %s3674_s2, %s2316_s29  ;;  %s2725_s14 = smov 127  }
   0xf   : > { %2457 = vmatprep.mubr.bf16.mxu0 %v2561_v4  ;;  %2474 = vmatpush3.bf16.msra.mxu1 %v2569_v7  ;;  %v2560_v11 = vld [vmem:[%s3675_s3] sm:$0xff]   ;;  %v2562_v14 = vld [vmem:[%s2795_s17 + $0x8] sm:$0xff]   ;;  %v2563_v15 = vld [vmem:[%s2795_s17 + $0x10] sm:$0xff]   ;;  %v421_v26 = vsub.s32 0, %v2849_v25 }
  0x10   : > { %2475 = vmatprep.subr.bf16.mxu1 %v2570_v8  ;;  %v2572_v12 = vld [vmem:[%s3676_s4 + $0x20] sm:$0xff]   ;;  %v2564_v16 = vld [vmem:[%s2795_s17 + $0x18] sm:$0xff]   ;;  %v2566_v18 = vld [vmem:[%s2795_s17 + $0x28] sm:$0xff]  }
  0x11   : > { %2444 = vmatpush3.bf16.msra.mxu0 %v2554_v1  ;;  %v2565_v17 = vld [vmem:[%s2795_s17 + $0x20] sm:$0xff]   ;;  %v2567_v19 = vld [vmem:[%s2795_s17 + $0x30] sm:$0xff]   ;;  %v2568_v20 = vld [vmem:[%s2795_s17 + $0x38] sm:$0xff]   ;;  %s2723_s17 = smov 32  }
  0x12   : > { %2445 = vmatprep.subr.bf16.mxu0 %v2555_v2  ;;  %v2574_v21 = vld [vmem:[%s3676_s4 + $0x10] sm:$0xff]   ;;  %v2575_v22 = vld [vmem:[%s3676_s4 + $0x8] sm:$0xff]   ;;  %v2576_v23 = vld [vmem:[%s3676_s4] sm:$0xff]  }
  0x13   : > { %2476 = vmatpush3.bf16.msra.mxu1 %v2570_v8  ;;  %v2855_v27 = vld [vmem:[%s3679_s7] sm:$0xff] }
  0x14   : > { %2477 = vmatprep.subr.bf16.mxu1 %v2571_v10  ;;  %v422_v29 = vrot.slane %v2855_v27, %v421_v26 }
  0x15   : > { %2446 = vmatpush3.bf16.msra.mxu0 %v2555_v2 }
  0x16   : > { %2447 = vmatprep.subr.bf16.mxu0 %v2556_v3 }
  0x17   : > { %2478 = vmatpush3.bf16.msra.mxu1 %v2571_v10 }
  0x18   : > { %2479 = vmatprep.subr.bf16.mxu1 %v2572_v12 }
  0x19   : > { %2448 = vmatpush3.bf16.msra.mxu0 %v2556_v3 }
  0x1a   : > { %2449 = vmatprep.subr.bf16.mxu0 %v2557_v5 }
  0x1b   : > { %2480 = vmatpush3.bf16.msra.mxu1 %v2572_v12 }
  0x1c   : > { %2481 = vmatprep.subr.bf16.mxu1 %v2573_v13 }
  0x1d   : > { %2450 = vmatpush3.bf16.msra.mxu0 %v2557_v5 }
  0x1e   : > { %2451 = vmatprep.subr.bf16.mxu0 %v2558_v6 }
  0x1f   : > { %2482 = vmatpush3.bf16.msra.mxu1 %v2573_v13 }
  0x20   : > { %2483 = vmatprep.subr.bf16.mxu1 %v2574_v21 }
  0x21   : > { %2452 = vmatpush3.bf16.msra.mxu0 %v2558_v6 }
  0x22   : > { %2453 = vmatprep.subr.bf16.mxu0 %v2559_v9 }
  0x23   : > { %2484 = vmatpush3.bf16.msra.mxu1 %v2574_v21  ;;  %v658_v21 = vsub.s32 1, %v2849_v25 }
  0x24   : > { %2485 = vmatprep.subr.bf16.mxu1 %v2575_v22 }
  0x25   : > { %2454 = vmatpush3.bf16.msra.mxu0 %v2559_v9 }
  0x26   : > { %2455 = vmatprep.subr.bf16.mxu0 %v2560_v11 }
  0x27   : > { %2486 = vmatpush3.bf16.msra.mxu1 %v2575_v22  ;;  %v659_v22 = vrot.slane %v2855_v27, %v658_v21 }
  0x28   : > { %2487 = vmatprep.subr.bf16.mxu1 %v2576_v23 }
  0x29   : > { %2456 = vmatpush3.bf16.msra.mxu0 %v2560_v11 }
  0x2b   : > { %2488 = vmatpush3.bf16.msra.mxu1 %v2576_v23 }
  0x2c   : > { %2458 = vmatmul.mubr.bf16.vlgmr.msra.gmra.mxu0 %v2562_v14 }
  0x2d   : > { %2461 = vmatprep.mubr.bf16.mxu0 %v2563_v15 }
  0x34   : > { %2462 = vmatmul.mubr.bf16.gmra.mxu0 %v2564_v16 }
  0x35   : > { %2465 = vmatprep.mubr.bf16.mxu0 %v2565_v17 }
  0x3c   : > { %2466 = vmatmul.mubr.bf16.gmra.mxu0 %v2566_v18 }
  0x3d   : > { %2469 = vmatprep.mubr.bf16.mxu0 %v2567_v19 }
  0x44   : > { %2470 = vmatmul.mubr.bf16.gmra.mxu0 %v2568_v20 }
  0xec   : > { %v2459_v28 = vpop.f32.mrf.mxu0 }
  0xed   : > { %v562_v34 = vadd.f32 %v2459_v28, %v422_v29 }
  0xee   : > { %v553_v30 = vpop.f32.mrf.mxu0 }
  0xef   : > { %v554_v32 = vadd.f32 %v553_v30, %v422_v29  ;;  %v618_v41 = vmax.f32 %v562_v34, 0.0 }
  0xf0   : > { %v2460_v31 = vpop.f32.mrf.mxu0 }
  0xf1   : > { %v565_v33 = vadd.f32 %v2460_v31, %v422_v29  ;;  %v616_v39 = vmax.f32 %v554_v32, 0.0 }
  0xf2   : > { %v556_v35 = vpop.f32.mrf.mxu0 }
  0xf3   : > { %v557_v36 = vadd.f32 %v556_v35, %v422_v29  ;;  %v619_v37 = vmax.f32 %v565_v33, 0.0 }
  0xf4   : > { %v2463_v38 = vpop.f32.mrf.mxu0 }
  0xf5   : > { %v617_v40 = vmax.f32 %v557_v36, 0.0  ;;  %v633_v44 = vpack.c.bf16 %v619_v37, %v618_v41  ;;  %v578_v45 = vadd.f32 %v2463_v38, %v422_v29 }
  0xf6   : > { %v569_v42 = vpop.f32.mrf.mxu0 }
  0xf7   : > { %v632_v43 = vpack.c.bf16 %v617_v40, %v616_v39  ;;  %v570_v47 = vadd.f32 %v569_v42, %v422_v29  ;;  %v622_v51 = vmax.f32 %v578_v45, 0.0 }
  0xf8   : > { %v2464_v46 = vpop.f32.mrf.mxu0 }
  0xf9   : > { %v581_v48 = vadd.f32 %v2464_v46, %v422_v29  ;;  %2489 = vmatprep.mubr.bf16.mxu1 %v632_v43  ;;  %v620_v54 = vmax.f32 %v570_v47, 0.0 }
  0xfa   : > { %v572_v49 = vpop.f32.mrf.mxu0  ;;  %2490 = vmatmul.mubr.bf16.vlgmr.msra.gmra.mxu1 %v633_v44 }
  0xfb   : > { %v573_v50 = vadd.f32 %v572_v49, %v422_v29  ;;  %v623_v52 = vmax.f32 %v581_v48, 0.0 }
  0xfc   : > { %v2467_v53 = vpop.f32.mrf.mxu0 }
  0xfd   : > { %v621_v55 = vmax.f32 %v573_v50, 0.0  ;;  %v635_v58 = vpack.c.bf16 %v623_v52, %v622_v51  ;;  %v594_v59 = vadd.f32 %v2467_v53, %v422_v29  ;;  %v2577_v53 = vld [vmem:[%s3677_s5 + $0x30] ss:$8 sps:$4 sm:$0xff]  }
  0xfe   : > { %v585_v56 = vpop.f32.mrf.mxu0 }
  0xff   : > { %v634_v57 = vpack.c.bf16 %v621_v55, %v620_v54  ;;  %v586_v61 = vadd.f32 %v585_v56, %v422_v29  ;;  %v626_v1 = vmax.f32 %v594_v59, 0.0  ;;  %v2579_v54 = vld [vmem:[%s3677_s5 + $0x34] ss:$8 sps:$4 sm:$0xff]   ;;  %v2582_v55 = vld [vmem:[%s3677_s5 + $0x24] ss:$8 sps:$4 sm:$0xff]  }
 0x100   : > { %v2468_v60 = vpop.f32.mrf.mxu0  ;;  %1055 = vmatprep.subr.bf16.mxu0 %v2579_v54  ;;  %2529 = vmatprep.subr.bf16.mxu1 %v2579_v54  ;;  %v2580_v59 = vld [vmem:[%s3677_s5 + $0x20] ss:$8 sps:$4 sm:$0xff]  }
 0x101   : > { %v597_v62 = vadd.f32 %v2468_v60, %v422_v29  ;;  %2493 = vmatprep.mubr.bf16.mxu1 %v634_v57  ;;  %v624_v4 = vmax.f32 %v586_v61, 0.0  ;;  %1056 = vmatpush1.bf16.msra.mxu0 %v2577_v53  ;;  %v2585_v60 = vld [vmem:[%s3677_s5 + $0x14] ss:$8 sps:$4 sm:$0xff]  }
 0x102   : > { %v588_v63 = vpop.f32.mrf.mxu0  ;;  %2494 = vmatmul.mubr.bf16.gmra.mxu1 %v635_v58  ;;  %1057 = vmatprep.subr.bf16.mxu0 %v2582_v55 }
 0x103   : > { %v589_v0 = vadd.f32 %v588_v63, %v422_v29  ;;  %v627_v2 = vmax.f32 %v597_v62, 0.0  ;;  %2533 = vmatpush1.bf16.msra.mxu1 %v2577_v53  ;;  %v2583_v62 = vld [vmem:[%s3677_s5 + $0x10] ss:$8 sps:$4 sm:$0xff]   ;;  %v2588_v63 = vld [vmem:[%s3677_s5 + $0x4] ss:$8 sps:$4 sm:$0xff]  }
 0x104   : > { %v2471_v3 = vpop.f32.mrf.mxu0  ;;  %2530 = vmatprep.subr.bf16.mxu1 %v2582_v55 }
 0x105   : > { %v625_v5 = vmax.f32 %v589_v0, 0.0  ;;  %v637_v8 = vpack.c.bf16 %v627_v2, %v626_v1  ;;  %v610_v9 = vadd.f32 %v2471_v3, %v422_v29  ;;  %1058 = vmatpush1.bf16.msra.mxu0 %v2580_v59  ;;  %v2586_v0 = vld [vmem:[%s3677_s5] ss:$8 sps:$4 sm:$0xff]   ;;  %v2722_v1 = vmov 0  }
 0x106   : > { %v601_v6 = vpop.f32.mrf.mxu0  ;;  %1059 = vmatprep.subr.bf16.mxu0 %v2585_v60  ;;  %1079 = vmatprep.mubr.bf16.mxu0 %v2722_v1 }
 0x107   : > { %v636_v7 = vpack.c.bf16 %v625_v5, %v624_v4  ;;  %v602_v11 = vadd.f32 %v601_v6, %v422_v29  ;;  %v630_v15 = vmax.f32 %v610_v9, 0.0  ;;  %2534 = vmatpush1.bf16.msra.mxu1 %v2580_v59  ;;  %2551 = vset.pattern.permute.xlu0 %v2722_v1 }
 0x108   : > { %v2472_v10 = vpop.f32.mrf.mxu0  ;;  %2531 = vmatprep.subr.bf16.mxu1 %v2585_v60  ;;  %2552 = vset.pattern.permute.xlu1 %v2722_v1 }
 0x109   : > { %v613_v12 = vadd.f32 %v2472_v10, %v422_v29  ;;  %2497 = vmatprep.mubr.bf16.mxu1 %v636_v7  ;;  %v628_v17 = vmax.f32 %v602_v11, 0.0  ;;  %1060 = vmatpush1.bf16.msra.mxu0 %v2583_v62 }
 0x10a   : > { %v604_v13 = vpop.f32.mrf.mxu0  ;;  %2498 = vmatmul.mubr.bf16.gmra.mxu1 %v637_v8  ;;  %1061 = vmatprep.subr.bf16.mxu0 %v2588_v63 }
 0x10b   : > { %v605_v14 = vadd.f32 %v604_v13, %v422_v29  ;;  %v631_v16 = vmax.f32 %v613_v12, 0.0  ;;  %2535 = vmatpush1.bf16.msra.mxu1 %v2583_v62 }
 0x10c   : > { %2532 = vmatprep.subr.bf16.mxu1 %v2588_v63  ;;  %v2593_v63 = vld [vmem:[%s2828_s20 + $0x20] sm:$0xff]  }
 0x10d   : > { %v629_v18 = vmax.f32 %v605_v14, 0.0  ;;  %v639_v20 = vpack.c.bf16 %v631_v16, %v630_v15  ;;  %1062 = vmatpush1.bf16.msra.mxu0 %v2586_v0 }
 0x10f   : > { %v638_v19 = vpack.c.bf16 %v629_v18, %v628_v17  ;;  %2536 = vmatpush1.bf16.msra.mxu1 %v2586_v0  ;;  %v2596_v0 = vld [vmem:[%s2828_s20 + $0x38] sm:$0xff]  }
 0x111   : > { %2501 = vmatprep.mubr.bf16.mxu1 %v638_v19 }
 0x112   : > { %2502 = vmatmul.mubr.bf16.gmra.mxu1 %v639_v20 }
 0x113   : > { %1139 = vmatprep.mubr.bf16.mxu1 %v2722_v1 }
 0x1ba   : > { %v2491_v23 = vpop.f32.mrf.mxu1 }
 0x1bb   : > { %v2860_v24 = vadd.f32 %v2491_v23, %v659_v22 }
 0x1bc   : > { %v742_v26 = vpop.f32.mrf.mxu1 }
 0x1bd   : > { %v2862_v28 = vadd.f32 %v742_v26, %v659_v22  ;;  %825 = vrot.lane.b32.xlu1 %v2860_v24, %s2721_s30 }
 0x1be   : > { %v2492_v29 = vpop.f32.mrf.mxu1 }
 0x1bf   : > { %v2866_v30 = vadd.f32 %v2492_v29, %v659_v22  ;;  %821 = vrot.lane.b32.xlu0 %v2862_v28, %s2721_s30 }
 0x1c0   : > { %v745_v31 = vpop.f32.mrf.mxu1 }
 0x1c1   : > { %v2870_v32 = vadd.f32 %v745_v31, %v659_v22  ;;  %827 = vrot.lane.b32.xlu1 %v2866_v30, %s2721_s30 }
 0x1c2   : > { %v2495_v33 = vpop.f32.mrf.mxu1 }
 0x1c3   : > { %823 = vrot.lane.b32.xlu0 %v2870_v32, %s2721_s30  ;;  %v2880_v38 = vadd.f32 %v2495_v33, %v659_v22 }
 0x1c4   : > { %v758_v34 = vpop.f32.mrf.mxu1 }
 0x1c5   : > { %v2876_v35 = vadd.f32 %v758_v34, %v659_v22 }
 0x1c6   : > { %v2496_v36 = vpop.f32.mrf.mxu1 }
 0x1c7   : > { %829 = vrot.lane.b32.xlu0 %v2876_v35, %s2721_s30  ;;  %v2888_v42 = vadd.f32 %v2496_v36, %v659_v22 }
 0x1c8   : > { %v761_v37 = vpop.f32.mrf.mxu1 }
 0x1c9   : > { %v2882_v39 = vadd.f32 %v761_v37, %v659_v22 }
 0x1ca   : > { %v2499_v40 = vpop.f32.mrf.mxu1 }
 0x1cb   : > { %831 = vrot.lane.b32.xlu1 %v2882_v39, %s2721_s30  ;;  %833 = vrot.lane.b32.xlu0 %v2880_v38, %s2721_s30  ;;  %v2896_v46 = vadd.f32 %v2499_v40, %v659_v22 }
 0x1cc   : > { %v774_v41 = vpop.f32.mrf.mxu1 }
 0x1cd   : > { %v2890_v43 = vadd.f32 %v774_v41, %v659_v22 }
 0x1ce   : > { %v2500_v44 = vpop.f32.mrf.mxu1 }
 0x1cf   : > { %835 = vrot.lane.b32.xlu1 %v2888_v42, %s2721_s30  ;;  %837 = vrot.lane.b32.xlu0 %v2890_v43, %s2721_s30  ;;  %v2904_v50 = vadd.f32 %v2500_v44, %v659_v22  ;;  %v2985_v44 = vld [vmem:[%s2982_s11] sm:$0xff] }
 0x1d0   : > { %v777_v45 = vpop.f32.mrf.mxu1 }
 0x1d1   : > { %v2898_v47 = vadd.f32 %v777_v45, %v659_v22  ;;  %v2988_v45 = vld [vmem:[%s2982_s11 + $0x8] sm:$0xff] }
 0x1d2   : > { %v2503_v48 = vpop.f32.mrf.mxu1 }
 0x1d3   : > { %839 = vrot.lane.b32.xlu1 %v2898_v47, %s2721_s30  ;;  %841 = vrot.lane.b32.xlu0 %v2896_v46, %s2721_s30  ;;  %v2921_v57 = vadd.f32 %v2503_v48, %v659_v22 }
 0x1d4   : > { %v790_v49 = vpop.f32.mrf.mxu1 }
 0x1d5   : > { %v2906_v51 = vadd.f32 %v790_v49, %v659_v22  ;;  %v2589_v49 = vld [vmem:[%s2828_s20 + $0x8] sm:$0xff]  }
 0x1d6   : > { %v2504_v52 = vpop.f32.mrf.mxu1 }
 0x1d7   : > { %843 = vrot.lane.b32.xlu1 %v2904_v50, %s2721_s30  ;;  %845 = vrot.lane.b32.xlu0 %v2906_v51, %s2721_s30  ;;  %v2935_v61 = vadd.f32 %v2504_v52, %v659_v22  ;;  %v2591_v52 = vld [vmem:[%s2828_s20 + $0x10] sm:$0xff]  }
 0x1d8   : > { %v793_v56 = vpop.f32.mrf.mxu1 }
 0x1d9   : > { %v2923_v58 = vadd.f32 %v793_v56, %v659_v22  ;;  %v2592_v56 = vld [vmem:[%s2828_s20 + $0x18] sm:$0xff]  }
 0x1db   : > { %847 = vrot.lane.b32.xlu1 %v2923_v58, %s2721_s30  ;;  %849 = vrot.lane.b32.xlu0 %v2921_v57, %s2721_s30 }
 0x1df   : > { %851 = vrot.lane.b32.xlu1 %v2935_v61, %s2721_s30 }
 0x22f   : > { %v826_v2 = vpop.permute.xlu1 %825 }
 0x230   : > { %v871_v5 = vmul.f32 %v826_v2, %v2860_v24 }
 0x231   : > { %v822_v3 = vpop.permute.xlu0 %821 }
 0x232   : > { %v869_v8 = vmul.f32 %v822_v3, %v2862_v28 }
 0x233   : > { %v828_v4 = vpop.permute.xlu1 %827 }
 0x234   : > { %v872_v6 = vmul.f32 %v828_v4, %v2866_v30 }
 0x235   : > { %v824_v7 = vpop.permute.xlu0 %823 }
 0x236   : > { %v886_v9 = vpack.c.bf16 %v872_v6, %v871_v5  ;;  %v870_v10 = vmul.f32 %v824_v7, %v2870_v32  ;;  %v2594_v5 = vld [vmem:[%s2828_s20 + $0x28] sm:$0xff]   ;;  %v2597_v7 = vld [vmem:[%s3678_s6 + $0x18] sm:$0xff]  }
 0x237   : > { %2505 = vmatprep.subr.bf16.mxu1 %v2597_v7 }
 0x238   : > { %v885_v11 = vpack.c.bf16 %v870_v10, %v869_v8  ;;  %943 = vrot.lane.b32.xlu1 %v886_v9, %s2723_s17  ;;  %v2598_v8 = vld [vmem:[%s3678_s6 + $0x10] sm:$0xff]   ;;  %v2600_v9 = vld [vmem:[%s3678_s6] sm:$0xff]  }
 0x239   : > { %v830_v12 = vpop.permute.xlu0 %829 }
 0x23a   : > { %941 = vrot.lane.b32.xlu0 %v885_v11, %s2723_s17  ;;  %v873_v15 = vmul.f32 %v830_v12, %v2876_v35 }
 0x23d   : > { %v832_v13 = vpop.permute.xlu1 %831  ;;  %v834_v14 = vpop.permute.xlu0 %833 }
 0x23e   : > { %v874_v16 = vmul.f32 %v832_v13, %v2882_v39  ;;  %v875_v20 = vmul.f32 %v834_v14, %v2880_v38 }
 0x240   : > { %v887_v17 = vpack.c.bf16 %v874_v16, %v873_v15 }
 0x241   : > { %v836_v18 = vpop.permute.xlu1 %835  ;;  %v838_v19 = vpop.permute.xlu0 %837 }
 0x242   : > { %v876_v21 = vmul.f32 %v836_v18, %v2888_v42  ;;  %945 = vrot.lane.b32.xlu0 %v887_v17, %s2723_s17  ;;  %v877_v26 = vmul.f32 %v838_v19, %v2890_v43 }
 0x244   : > { %v888_v22 = vpack.c.bf16 %v876_v21, %v875_v20 }
 0x245   : > { %v840_v23 = vpop.permute.xlu1 %839  ;;  %v842_v24 = vpop.permute.xlu0 %841 }
 0x246   : > { %v878_v28 = vmul.f32 %v840_v23, %v2898_v47  ;;  %947 = vrot.lane.b32.xlu1 %v888_v22, %s2723_s17  ;;  %v879_v32 = vmul.f32 %v842_v24, %v2896_v46  ;;  %v2590_v46 = vld [vmem:[%s2828_s20] sm:$0xff]  }
 0x248   : > { %v889_v29 = vpack.c.bf16 %v878_v28, %v877_v26 }
 0x249   : > { %v844_v30 = vpop.permute.xlu1 %843  ;;  %v846_v31 = vpop.permute.xlu0 %845 }
 0x24a   : > { %v880_v33 = vmul.f32 %v844_v30, %v2904_v50  ;;  %949 = vrot.lane.b32.xlu0 %v889_v29, %s2723_s17  ;;  %v881_v36 = vmul.f32 %v846_v31, %v2906_v51 }
 0x24c   : > { %v890_v34 = vpack.c.bf16 %v880_v33, %v879_v32 }
 0x24d   : > { %v848_v35 = vpop.permute.xlu1 %847  ;;  %v850_v38 = vpop.permute.xlu0 %849 }
 0x24e   : > { %v882_v37 = vmul.f32 %v848_v35, %v2923_v58  ;;  %951 = vrot.lane.b32.xlu1 %v890_v34, %s2723_s17  ;;  %v883_v41 = vmul.f32 %v850_v38, %v2921_v57  ;;  %v2595_v57 = vld [vmem:[%s2828_s20 + $0x30] sm:$0xff]  }
 0x250   : > { %v891_v39 = vpack.c.bf16 %v882_v37, %v881_v36 }
 0x251   : > { %v852_v40 = vpop.permute.xlu1 %851 }
 0x252   : > { %v884_v42 = vmul.f32 %v852_v40, %v2935_v61  ;;  %953 = vrot.lane.b32.xlu0 %v891_v39, %s2723_s17 }
 0x254   : > { %v892_v43 = vpack.c.bf16 %v884_v42, %v883_v41  ;;  %v3123_v41 = vld [vmem:[%s2982_s11 + $0x18] sm:$0xff] }
 0x256   : > { %955 = vrot.lane.b32.xlu1 %v892_v43, %s2723_s17  ;;  %1511 = vperm.xlu0 %2551, %v2985_v44   ;;  %v3131_v43 = vld [vmem:[%s2982_s11 + $0x28] sm:$0xff]  ;;  %s3635_s17 = scalar_lea.vmem %s3680_s8, %s2316_s29 }
 0x25a   : > { %1516 = vperm.xlu1 %2552, %v2988_v45  }
 0x2aa   : > { %v944_v50 = vpop.permute.xlu1 %943 }
 0x2ab   : > { %v963_v51 = vsel %vm957_vm1, %v2589_v49, %v944_v50  ;;  %v3147_v49 = vld [vmem:[%s2982_s11 + $0x48] sm:$0xff]  ;;  %v3150_v50 = vld [vmem:[%s2982_s11 + $0x30] sm:$0xff] }
 0x2ac   : > { %v942_v47 = vpop.permute.xlu0 %941 }
 0x2ad   : > { %v960_v48 = vsel %vm957_vm1, %v2590_v46, %v942_v47  ;;  %v3134_v46 = vld [vmem:[%s2982_s11 + $0x10] sm:$0xff]  ;;  %v3139_v47 = vld [vmem:[%s2982_s11 + $0x38] sm:$0xff] }
 0x2ae   : > { %2359 = vmatmul.mubr.msk.bf16.vlgmr.msra.gmra.mxu0 %vm1030_vm0, %v960_v48  ;;  %v3142_v48 = vld [vmem:[%s2982_s11 + $0x20] sm:$0xff] }
 0x2af   : > { %1089 = vmatprep.mubr.bf16.mxu0 %v2722_v1 }
 0x2b4   : > { %v946_v53 = vpop.permute.xlu0 %945 }
 0x2b5   : > { %v966_v54 = vsel %vm957_vm1, %v2591_v52, %v946_v53  ;;  %v3158_v52 = vld [vmem:[%s2982_s11 + $0x40] sm:$0xff]  ;;  %v3163_v53 = vld [vmem:[%s2982_s11 + $0x68] sm:$0xff] }
 0x2b6   : > { %2360 = vmatmul.mubr.msk.bf16.gmra.mxu0 %vm1030_vm0, %v963_v51  ;;  %v3155_v51 = vld [vmem:[%s2982_s11 + $0x58] sm:$0xff] }
 0x2b7   : > { %1099 = vmatprep.mubr.bf16.mxu0 %v2722_v1 }
 0x2b8   : > { %v948_v58 = vpop.permute.xlu1 %947 }
 0x2b9   : > { %v969_v60 = vsel %vm957_vm1, %v2592_v56, %v948_v58  ;;  %v1591_v56 = vsub.s32 4, %v2849_v25 }
 0x2bb   : > { %v3176_v58 = vrot.slane %v2855_v27, %v1591_v56 }
 0x2bc   : > { %v950_v55 = vpop.permute.xlu0 %949 }
 0x2bd   : > { %v972_v3 = vsel %vm957_vm1, %v2593_v63, %v950_v55  ;;  %v3171_v55 = vld [vmem:[%s2982_s11 + $0x60] sm:$0xff] }
 0x2be   : > { %2361 = vmatmul.mubr.msk.bf16.gmra.mxu0 %vm1030_vm0, %v966_v54  ;;  %v3166_v54 = vld [vmem:[%s2982_s11 + $0x50] sm:$0xff] }
 0x2bf   : > { %1109 = vmatprep.mubr.bf16.mxu0 %v2722_v1 }
 0x2c0   : > { %v952_v62 = vpop.permute.xlu1 %951 }
 0x2c1   : > { %v975_v6 = vsel %vm957_vm1, %v2594_v5, %v952_v62 }
 0x2c4   : > { %v954_v59 = vpop.permute.xlu0 %953 }
 0x2c5   : > { %v978_v61 = vsel %vm957_vm1, %v2595_v57, %v954_v59 }
 0x2c6   : > { %2362 = vmatmul.mubr.msk.bf16.gmra.mxu0 %vm1030_vm0, %v969_v60  ;;  %2365 = vmatmul.mubr.msk.bf16.vlgmr.msra.gmra.mxu1 %vm1030_vm0, %v978_v61  ;;  %v1627_v60 = vsub.s32 3, %v2849_v25 }
 0x2c7   : > { %1119 = vmatprep.mubr.bf16.mxu0 %v2722_v1  ;;  %1149 = vmatprep.mubr.bf16.mxu1 %v2722_v1 }
 0x2c8   : > { %v956_v2 = vpop.permute.xlu1 %955  ;;  %2506 = vmatpush3.bf16.msra.mxu1 %v2597_v7  ;;  %v3182_v63 = vrot.slane %v2855_v27, %v1627_v60 }
 0x2c9   : > { %v981_v4 = vsel %vm957_vm1, %v2596_v0, %v956_v2  ;;  %2507 = vmatprep.subr.bf16.mxu1 %v2598_v8 }
 0x2cc   : > { %2508 = vmatpush3.bf16.msra.mxu1 %v2598_v8 }
 0x2ce   : > { %2363 = vmatmul.mubr.msk.bf16.gmra.mxu0 %vm1030_vm0, %v972_v3  ;;  %2366 = vmatmul.mubr.msk.bf16.gmra.mxu1 %vm1030_vm0, %v981_v4  ;;  %v1663_v3 = vsub.s32 6, %v2849_v25 }
 0x2cf   : > { %1129 = vmatprep.mubr.bf16.mxu0 %v2722_v1  ;;  %v2599_v1 = vld [vmem:[%s3678_s6 + $0x8] sm:$0xff]  }
 0x2d0   : > { %2509 = vmatprep.subr.bf16.mxu1 %v2599_v1 }
 0x2d1   : > { %2510 = vmatpush3.bf16.msra.mxu1 %v2599_v1  ;;  %v1512_v62 = vpop.permute.xlu0 %1511 }
 0x2d2   : > { %2511 = vmatprep.subr.bf16.mxu1 %v2600_v9  ;;  %v1593_v2 = vmul.f32 %v3176_v58, %v1512_v62 }
 0x2d5   : > { %2512 = vmatpush3.bf16.msra.mxu1 %v2600_v9  ;;  %v1517_v57 = vpop.permute.xlu1 %1516 }
 0x2d6   : > { %2364 = vmatmul.mubr.msk.bf16.gmra.mxu0 %vm1030_vm0, %v975_v6  ;;  %v1594_v59 = vmul.f32 %v3176_v58, %v1517_v57  ;;  %v3189_v6 = vrot.slane %v2855_v27, %v1663_v3 }
 0x36e   : > { %v3034_v10 = vpop.f32.mrf.mxu0 }
 0x36f   : > { %1176 = vrot.lane.b32.xlu0 %v3034_v10, %s2724_s22 }
 0x370   : > { %v3038_v11 = vpop.f32.mrf.mxu0 }
 0x371   : > { %v1609_v5 = vadd.f32 %v1593_v2, %v3038_v11 }
 0x372   : > { %v3040_v12 = vpop.f32.mrf.mxu0 }
 0x373   : > { %1178 = vrot.lane.b32.xlu1 %v3040_v12, %s2724_s22  ;;  %v1629_v8 = vadd.f32 %v3182_v63, %v1609_v5 }
 0x374   : > { %v3044_v13 = vpop.f32.mrf.mxu0 }
 0x375   : > { %v1610_v61 = vadd.f32 %v1594_v59, %v3044_v13  ;;  %v1645_v9 = vmax.f32 %v1629_v8, 0.0 }
 0x376   : > { %v3046_v14 = vpop.f32.mrf.mxu0 }
 0x377   : > { %1180 = vrot.lane.b32.xlu0 %v3046_v14, %s2724_s22  ;;  %v1630_v0 = vadd.f32 %v3182_v63, %v1610_v61  ;;  %v1665_v13 = vmul.f32 %v3189_v6, %v1645_v9 }
 0x378   : > { %v3050_v15 = vpop.f32.mrf.mxu0 }
 0x379   : > { %v1646_v4 = vmax.f32 %v1630_v0, 0.0  ;;  %v1681_v56 = vsel %vm957_vm1, %v1665_v13, 0.0 }
 0x37a   : > { %v3052_v16 = vpop.f32.mrf.mxu0 }
 0x37b   : > { %1182 = vrot.lane.b32.xlu1 %v3052_v16, %s2724_s22  ;;  %v1666_v7 = vmul.f32 %v3189_v6, %v1646_v4 }
 0x37c   : > { %v3056_v17 = vpop.f32.mrf.mxu0 }
 0x37d   : > { %v1684_v1 = vsel %vm957_vm1, %v1666_v7, 0.0 }
 0x37e   : > { %v3058_v18 = vpop.f32.mrf.mxu0 }
 0x37f   : > { %1184 = vrot.lane.b32.xlu0 %v3058_v18, %s2724_s22 }
 0x380   : > { %v3062_v19 = vpop.f32.mrf.mxu0 }
 0x382   : > { %v3064_v20 = vpop.f32.mrf.mxu0 }
 0x383   : > { %1186 = vrot.lane.b32.xlu1 %v3064_v20, %s2724_s22 }
 0x384   : > { %v3068_v21 = vpop.f32.mrf.mxu0 }
 0x386   : > { %v3070_v22 = vpop.f32.mrf.mxu0  ;;  %v3072_v23 = vpop.f32.mrf.mxu1 }
 0x387   : > { %1188 = vrot.lane.b32.xlu0 %v3070_v22, %s2724_s22 }
 0x388   : > { %v3076_v24 = vpop.f32.mrf.mxu0  ;;  %v3078_v26 = vpop.f32.mrf.mxu1 }
 0x38a   : > { %v3080_v28 = vpop.f32.mrf.mxu0  ;;  %v3082_v29 = vpop.f32.mrf.mxu1 }
 0x38b   : > { %1190 = vrot.lane.b32.xlu1 %v3080_v28, %s2724_s22  ;;  %1200 = vrot.lane.b32.xlu0 %v3072_v23, %s2724_s22 }
 0x38c   : > { %v3088_v30 = vpop.f32.mrf.mxu0  ;;  %v3090_v31 = vpop.f32.mrf.mxu1 }
 0x38e   : > { %v3092_v32 = vpop.f32.mrf.mxu0  ;;  %v3094_v33 = vpop.f32.mrf.mxu1 }
 0x38f   : > { %1192 = vrot.lane.b32.xlu0 %v3092_v32, %s2724_s22  ;;  %1202 = vrot.lane.b32.xlu1 %v3082_v29, %s2724_s22 }
 0x390   : > { %v3100_v34 = vpop.f32.mrf.mxu0  ;;  %v3102_v35 = vpop.f32.mrf.mxu1 }
 0x392   : > { %v3104_v36 = vpop.f32.mrf.mxu0  ;;  %v3112_v38 = vpop.f32.mrf.mxu1 }
 0x393   : > { %1194 = vrot.lane.b32.xlu1 %v3104_v36, %s2724_s22  ;;  %1204 = vrot.lane.b32.xlu0 %v3094_v33, %s2724_s22 }
 0x394   : > { %v3110_v37 = vpop.f32.mrf.mxu0 }
 0x396   : > { %v3114_v39 = vpop.f32.mrf.mxu0 }
 0x397   : > { %1196 = vrot.lane.b32.xlu0 %v3114_v39, %s2724_s22  ;;  %1206 = vrot.lane.b32.xlu1 %v3112_v38, %s2724_s22 }
 0x398   : > { %v3120_v40 = vpop.f32.mrf.mxu0 }
 0x39a   : > { %v3125_v42 = vpop.f32.mrf.mxu0 }
 0x39b   : > { %1526 = vperm.xlu0 %2551, %v3123_v41   ;;  %1198 = vrot.lane.b32.xlu1 %v3125_v42, %s2724_s22 }
 0x39f   : > { %1536 = vperm.xlu0 %2551, %v3131_v43   ;;  %1521 = vperm.xlu1 %2552, %v3134_v46  }
 0x3a3   : > { %1546 = vperm.xlu0 %2551, %v3139_v47   ;;  %1531 = vperm.xlu1 %2552, %v3142_v48  }
 0x3a7   : > { %1556 = vperm.xlu0 %2551, %v3147_v49   ;;  %1541 = vperm.xlu1 %2552, %v3150_v50  }
 0x3ab   : > { %1566 = vperm.xlu0 %2551, %v3155_v51   ;;  %1551 = vperm.xlu1 %2552, %v3158_v52  }
 0x3af   : > { %1576 = vperm.xlu0 %2551, %v3163_v53   ;;  %1561 = vperm.xlu1 %2552, %v3166_v54  }
 0x3b3   : > { %1571 = vperm.xlu1 %2552, %v3171_v55  }
 0x3ce   : > { %1685 = vadd.xlane.f32.xlu0 %v1684_v1 }
 0x3d7   : > { %1682 = vadd.xlane.f32.xlu1 %v1681_v56 }
 0x3e1   : > { %v1177_v57 = vpop.permute.xlu0 %1176 }
 0x3e2   : > { %v1224_v11 = vmul.f32 %v1177_v57, %v3034_v10 }
 0x3e5   : > { %v1179_v59 = vpop.permute.xlu1 %1178 }
 0x3e6   : > { %v1225_v60 = vmul.f32 %v1179_v59, %v3040_v12 }
 0x3e8   : > { %v1240_v61 = vpack.c.bf16 %v1225_v60, %v1224_v11 }
 0x3e9   : > { %v1181_v62 = vpop.permute.xlu0 %1180 }
 0x3ea   : > { %2513 = vmatprep.mubr.msk.bf16.mxu1 %vm1030_vm0, %v1240_v61  ;;  %v1226_v2 = vmul.f32 %v1181_v62, %v3046_v14 }
 0x3ed   : > { %v1183_v0 = vpop.permute.xlu1 %1182 }
 0x3ee   : > { %v1227_v3 = vmul.f32 %v1183_v0, %v3052_v16 }
 0x3f0   : > { %v1241_v4 = vpack.c.bf16 %v1227_v3, %v1226_v2 }
 0x3f1   : > { %v1185_v5 = vpop.permute.xlu0 %1184 }
 0x3f2   : > { %2514 = vmatmul.mubr.msk.bf16.vlgmr.msra.gmra.mxu1 %vm1030_vm0, %v1241_v4  ;;  %v1228_v8 = vmul.f32 %v1185_v5, %v3058_v18 }
 0x3f5   : > { %v1187_v7 = vpop.permute.xlu1 %1186 }
 0x3f6   : > { %v1229_v10 = vmul.f32 %v1187_v7, %v3064_v20 }
 0x3f8   : > { %v1242_v1 = vpack.c.bf16 %v1229_v10, %v1228_v8 }
 0x3f9   : > { %v1189_v12 = vpop.permute.xlu0 %1188 }
 0x3fa   : > { %2517 = vmatprep.mubr.msk.bf16.mxu1 %vm1030_vm0, %v1242_v1  ;;  %v1230_v56 = vmul.f32 %v1189_v12, %v3070_v22 }
 0x3fd   : > { %v1191_v9 = vpop.permute.xlu1 %1190  ;;  %v1201_v13 = vpop.permute.xlu0 %1200 }
 0x3fe   : > { %v1231_v14 = vmul.f32 %v1191_v9, %v3080_v28  ;;  %v1236_v4 = vmul.f32 %v1201_v13, %v3072_v23 }
 0x400   : > { %v1243_v16 = vpack.c.bf16 %v1231_v14, %v1230_v56 }
 0x401   : > { %v1203_v57 = vpop.permute.xlu1 %1202  ;;  %v1193_v59 = vpop.permute.xlu0 %1192 }
 0x402   : > { %2518 = vmatmul.mubr.msk.bf16.gmra.mxu1 %vm1030_vm0, %v1243_v16  ;;  %v1232_v18 = vmul.f32 %v1193_v59, %v3092_v32  ;;  %v1237_v22 = vmul.f32 %v1203_v57, %v3082_v29 }
 0x404   : > { %v1246_v7 = vpack.c.bf16 %v1237_v22, %v1236_v4 }
 0x405   : > { %v1195_v11 = vpop.permute.xlu1 %1194  ;;  %v1205_v60 = vpop.permute.xlu0 %1204 }
 0x406   : > { %v1233_v20 = vmul.f32 %v1195_v11, %v3104_v36  ;;  %v1238_v36 = vmul.f32 %v1205_v60, %v3094_v33 }
 0x408   : > { %v1244_v61 = vpack.c.bf16 %v1233_v20, %v1232_v18 }
 0x409   : > { %v1207_v62 = vpop.permute.xlu1 %1206  ;;  %v1197_v0 = vpop.permute.xlu0 %1196 }
 0x40a   : > { %2521 = vmatprep.mubr.msk.bf16.mxu1 %vm1030_vm0, %v1244_v61  ;;  %v1234_v28 = vmul.f32 %v1197_v0, %v3114_v39  ;;  %v1239_v32 = vmul.f32 %v1207_v62, %v3112_v38 }
 0x40c   : > { %v1247_v10 = vpack.c.bf16 %v1239_v32, %v1238_v36 }
 0x40d   : > { %v1199_v2 = vpop.permute.xlu1 %1198 }
 0x40e   : > { %v1235_v3 = vmul.f32 %v1199_v2, %v3125_v42 }
 0x410   : > { %v1245_v5 = vpack.c.bf16 %v1235_v3, %v1234_v28 }
 0x412   : > { %2522 = vmatmul.mubr.msk.bf16.gmra.mxu1 %vm1030_vm0, %v1245_v5 }
 0x413   : > { %2525 = vmatprep.mubr.msk.bf16.mxu1 %vm1030_vm0, %v1246_v7 }
 0x416   : > { %v1527_v8 = vpop.permute.xlu0 %1526 }
 0x417   : > { %v1596_v29 = vmul.f32 %v3176_v58, %v1527_v8 }
 0x419   : > { %v1612_v39 = vadd.f32 %v1596_v29, %v3056_v17 }
 0x41a   : > { %v1522_v1 = vpop.permute.xlu1 %1521  ;;  %2526 = vmatmul.mubr.msk.bf16.gmra.mxu1 %vm1030_vm0, %v1247_v10  ;;  %v1537_v23 = vpop.permute.xlu0 %1536 }
 0x41b   : > { %v1595_v42 = vmul.f32 %v3176_v58, %v1522_v1  ;;  %v1598_v12 = vmul.f32 %v3176_v58, %v1537_v23  ;;  %v1632_v9 = vadd.f32 %v3182_v63, %v1612_v39 }
 0x41d   : > { %v1611_v38 = vadd.f32 %v1595_v42, %v3050_v15  ;;  %v1614_v33 = vadd.f32 %v1598_v12, %v3068_v21  ;;  %v1648_v13 = vmax.f32 %v1632_v9, 0.0 }
 0x41e   : > { %v1532_v56 = vpop.permute.xlu1 %1531  ;;  %v1547_v14 = vpop.permute.xlu0 %1546 }
 0x41f   : > { %v1597_v16 = vmul.f32 %v3176_v58, %v1532_v56  ;;  %v1600_v17 = vmul.f32 %v3176_v58, %v1547_v14  ;;  %v1668_v57 = vmul.f32 %v3189_v6, %v1648_v13  ;;  %v1631_v59 = vadd.f32 %v3182_v63, %v1611_v38 }
 0x420   : > { %v1634_v11 = vadd.f32 %v3182_v63, %v1614_v33 }
 0x421   : > { %v1613_v60 = vadd.f32 %v1597_v16, %v3062_v19  ;;  %v1616_v18 = vadd.f32 %v1600_v17, %v3088_v30  ;;  %v1690_v15 = vsel %vm957_vm1, %v1668_v57, 0.0  ;;  %v1647_v21 = vmax.f32 %v1631_v59, 0.0 }
 0x422   : > { %v1542_v20 = vpop.permute.xlu1 %1541  ;;  %1691 = vadd.xlane.f32.xlu1 %v1690_v15  ;;  %v3235_v61 = vpop.permute.xlu0 %1556  ;;  %v1650_v62 = vmax.f32 %v1634_v11, 0.0 }
 0x423   : > { %v1599_v0 = vmul.f32 %v3176_v58, %v1542_v20  ;;  %v1667_v22 = vmul.f32 %v3189_v6, %v1647_v21  ;;  %v1633_v2 = vadd.f32 %v3182_v63, %v1613_v60  ;;  %v1636_v19 = vadd.f32 %v3182_v63, %v1616_v18 }
 0x424   : > { %v1670_v28 = vmul.f32 %v3189_v6, %v1650_v62 }
 0x425   : > { %v1615_v30 = vadd.f32 %v1599_v0, %v3076_v24  ;;  %v1687_v3 = vsel %vm957_vm1, %v1667_v22, 0.0  ;;  %v1649_v4 = vmax.f32 %v1633_v2, 0.0  ;;  %v1652_v36 = vmax.f32 %v1636_v19, 0.0 }
 0x426   : > { %1688 = vadd.xlane.f32.xlu0 %v1687_v3  ;;  %v1552_v5 = vpop.permute.xlu1 %1551  ;;  %v1696_v7 = vsel %vm957_vm1, %v1670_v28, 0.0  ;;  %v3245_v32 = vpop.permute.xlu0 %1566  ;;  %v1921_v22 = vadd.f32 1.0, %v2985_v44  ;;  %v1922_v28 = vadd.f32 1.0, %v2988_v45 }
 0x427   : > { %v1601_v8 = vmul.f32 %v3176_v58, %v1552_v5  ;;  %1697 = vadd.xlane.f32.xlu1 %v1696_v7  ;;  %v1669_v29 = vmul.f32 %v3189_v6, %v1649_v4  ;;  %v1635_v10 = vadd.f32 %v3182_v63, %v1615_v30  ;;  %v1672_v39 = vmul.f32 %v3189_v6, %v1652_v36 }
 0x428   : > { %v1937_v2 = vmul.f32 %v1921_v22, %v2985_v44  ;;  %v1938_v19 = vmul.f32 %v1922_v28, %v2988_v45  ;;  %v1924_v30 = vadd.f32 1.0, %v3123_v41  ;;  %v1926_v4 = vadd.f32 1.0, %v3131_v43 }
 0x429   : > { %v1617_v24 = vadd.f32 %v1601_v8, %v3100_v34  ;;  %v1693_v1 = vsel %vm957_vm1, %v1669_v29, 0.0  ;;  %v1651_v23 = vmax.f32 %v1635_v10, 0.0  ;;  %v1702_v12 = vsel %vm957_vm1, %v1672_v39, 0.0  ;;  %v3297_v29 = vld [vmem:[%s2982_s11 + $0x78] sm:$0xff] }
 0x42a   : > { %1694 = vadd.xlane.f32.xlu0 %v1693_v1  ;;  %v3253_v42 = vpop.permute.xlu1 %1561  ;;  %v1577_v9 = vpop.permute.xlu0 %1576  ;;  %v1940_v3 = vmul.f32 %v1924_v30, %v3123_v41  ;;  %v1942_v44 = vmul.f32 %v1926_v4, %v3131_v43  ;;  %v1928_v5 = vadd.f32 1.0, %v3139_v47  ;;  %v1930_v45 = vadd.f32 1.0, %v3147_v49 }
 0x42b   : > { %1703 = vadd.xlane.f32.xlu1 %v1702_v12  ;;  %v1606_v38 = vmul.f32 %v3176_v58, %v1577_v9  ;;  %v1671_v33 = vmul.f32 %v3189_v6, %v1651_v23  ;;  %v1637_v13 = vadd.f32 %v3182_v63, %v1617_v24  ;;  %v1932_v41 = vadd.f32 1.0, %v3155_v51 }
 0x42c   : > { %v1944_v7 = vmul.f32 %v1928_v5, %v3139_v47  ;;  %v1946_v36 = vmul.f32 %v1930_v45, %v3147_v49  ;;  %v1934_v43 = vadd.f32 1.0, %v3163_v53  ;;  %v1936_v10 = vadd.f32 1.0, %v3297_v29 }
 0x42d   : > { %v1622_v56 = vadd.f32 %v1606_v38, %v3090_v31  ;;  %v1699_v34 = vsel %vm957_vm1, %v1671_v33, 0.0  ;;  %v1653_v14 = vmax.f32 %v1637_v13, 0.0  ;;  %v1948_v8 = vmul.f32 %v1932_v41, %v3155_v51 }
 0x42e   : > { %1700 = vadd.xlane.f32.xlu0 %v1699_v34  ;;  %v1572_v16 = vpop.permute.xlu1 %1571  ;;  %v1950_v47 = vmul.f32 %v1934_v43, %v3163_v53  ;;  %v1952_v49 = vmul.f32 %v1936_v10, %v3297_v29  ;;  %v1602_v39 = vmul.f32 %v3176_v58, %v3235_v61  ;;  %v1258_v9 = vsub.s32 2, %v2849_v25  ;;  %v3326_v34 = vld [vmem:[%s3679_s7] sm:$0xff] }
 0x42f   : > { %v1605_v17 = vmul.f32 %v3176_v58, %v1572_v16  ;;  %v1673_v57 = vmul.f32 %v3189_v6, %v1653_v14  ;;  %v1642_v59 = vadd.f32 %v3182_v63, %v1622_v56  ;;  %v1423_v61 = vsub.s32 5, %v2849_v25 }
 0x430   : > { %v1618_v51 = vadd.f32 %v1602_v39, %v3110_v37  ;;  %v3317_v33 = vrot.slane %v2855_v27, %v1258_v9  ;;  %v3320_v37 = vpop.f32.mrf.mxu1 }
 0x431   : > { %v1621_v11 = vadd.f32 %v1605_v17, %v3078_v26  ;;  %v1705_v60 = vsel %vm957_vm1, %v1673_v57, 0.0  ;;  %v1658_v18 = vmax.f32 %v1642_v59, 0.0  ;;  %v3273_v26 = vld [vmem:[%s2982_s11 + $0x70] sm:$0xff]  ;;  %v3329_v14 = vrot.slane %v3326_v34, %v1423_v61 }
 0x432   : > { %1706 = vadd.xlane.f32.xlu0 %v1705_v60  ;;  %v1638_v24 = vadd.f32 %v3182_v63, %v1618_v51 }
 0x433   : > { %v1678_v31 = vmul.f32 %v3189_v6, %v1658_v18  ;;  %v1641_v15 = vadd.f32 %v3182_v63, %v1621_v11 }
 0x434   : > { %v1654_v1 = vmax.f32 %v1638_v24, 0.0 }
 0x435   : > { %v1720_v21 = vsel %vm957_vm1, %v1678_v31, 0.0  ;;  %v1657_v20 = vmax.f32 %v1641_v15, 0.0 }
 0x436   : > { %1721 = vadd.xlane.f32.xlu1 %v1720_v21  ;;  %v1674_v23 = vmul.f32 %v3189_v6, %v1654_v1 }
 0x437   : > { %v1677_v62 = vmul.f32 %v3189_v6, %v1657_v20 }
 0x438   : > { %v1708_v53 = vsel %vm957_vm1, %v1674_v23, 0.0 }
 0x439   : > { %v1717_v0 = vsel %vm957_vm1, %v1677_v62, 0.0 }
 0x43a   : > { %1718 = vadd.xlane.f32.xlu0 %v1717_v0 }
 0x447   : > { %1581 = vperm.xlu1 %2552, %v3273_v26  }
 0x44b   : > { %1969 = vrot.lane.b32.xlu1 %v1937_v2, %s2725_s14 }
 0x44f   : > { %1971 = vrot.lane.b32.xlu1 %v1938_v19, %s2725_s14 }
 0x453   : > { %1975 = vrot.lane.b32.xlu1 %v1940_v3, %s2725_s14 }
 0x457   : > { %1979 = vrot.lane.b32.xlu1 %v1942_v44, %s2725_s14 }
 0x45b   : > { %1983 = vrot.lane.b32.xlu1 %v1944_v7, %s2725_s14 }
 0x45f   : > { %1987 = vrot.lane.b32.xlu1 %v1946_v36, %s2725_s14 }
 0x460   : > { %v3311_v12 = vpop.xlane.xlu1 %1682 }
 0x463   : > { %1991 = vrot.lane.b32.xlu1 %v1948_v8, %s2725_s14 }
 0x467   : > { %1995 = vrot.lane.b32.xlu1 %v1950_v47, %s2725_s14 }
 0x46b   : > { %1999 = vrot.lane.b32.xlu1 %v1952_v49, %s2725_s14 }
 0x48f   : > { %1709 = vadd.xlane.f32.xlu1 %v1708_v53 }
 0x4ab   : > { %v3314_v38 = vpop.xlane.xlu1 %1691 }
 0x4b0   : > { %v3331_v17 = vpop.xlane.xlu1 %1697 }
 0x4b2   : > { %v2515_v13 = vpop.f32.mrf.mxu1 }
 0x4b3   : > { %v1351_v56 = vadd.f32 %v2515_v13, %v3317_v33 }
 0x4b4   : > { %v1342_v16 = vpop.f32.mrf.mxu1  ;;  %v3340_v18 = vpop.xlane.xlu1 %1703 }
 0x4b5   : > { %v1407_v27 = vmax.f32 %v1351_v56, 0.0  ;;  %v1343_v57 = vadd.f32 %v1342_v16, %v3317_v33 }
 0x4b6   : > { %v3342_v31 = vpop.f32.mrf.mxu1 }
 0x4b7   : > { %v3335_v59 = vmul.f32 %v3329_v14, %v1407_v27  ;;  %v1405_v11 = vmax.f32 %v1343_v57, 0.0 }
 0x4b8   : > { %v3346_v21 = vpop.f32.mrf.mxu1 }
 0x4b9   : > { %v3338_v60 = vmul.f32 %v3329_v14, %v1405_v11  ;;  %v1923_v11 = vadd.f32 1.0, %v3134_v46 }
 0x4bf   : > { %v3344_v15 = vpop.xlane.xlu1 %1721 }
 0x4c2   : > { %v2519_v20 = vpop.f32.mrf.mxu1 }
 0x4c3   : > { %v1367_v62 = vadd.f32 %v2519_v20, %v3317_v33  ;;  %v1582_v0 = vpop.permute.xlu1 %1581  ;;  %v1939_v20 = vmul.f32 %v1923_v11, %v3134_v46 }
 0x4c4   : > { %v1607_v22 = vmul.f32 %v3176_v58, %v1582_v0  ;;  %v1358_v2 = vpop.f32.mrf.mxu1 }
 0x4c5   : > { %v1411_v28 = vmax.f32 %v1367_v62, 0.0  ;;  %v1359_v19 = vadd.f32 %v1358_v2, %v3317_v33  ;;  %v1925_v62 = vadd.f32 1.0, %v3142_v48 }
 0x4c6   : > { %v1623_v30 = vadd.f32 %v1607_v22, %v3102_v35  ;;  %v3359_v45 = vpop.f32.mrf.mxu1  ;;  %v1927_v22 = vadd.f32 1.0, %v3150_v50 }
 0x4c7   : > { %v3353_v3 = vmul.f32 %v3329_v14, %v1411_v28  ;;  %v1409_v4 = vmax.f32 %v1359_v19, 0.0  ;;  %v1941_v0 = vmul.f32 %v1925_v62, %v3142_v48  ;;  %v3392_v2 = vpop.permute.xlu1 %1969  ;;  %v1929_v19 = vadd.f32 1.0, %v3158_v52 }
 0x4c8   : > { %v1643_v44 = vadd.f32 %v3182_v63, %v1623_v30  ;;  %v3363_v8 = vpop.f32.mrf.mxu1  ;;  %v1943_v28 = vmul.f32 %v1927_v22, %v3150_v50 }
 0x4c9   : > { %v3357_v5 = vmul.f32 %v3329_v14, %v1409_v4  ;;  %v1945_v46 = vmul.f32 %v1929_v19, %v3158_v52  ;;  %v1931_v4 = vadd.f32 1.0, %v3166_v54 }
 0x4ca   : > { %v1659_v7 = vmax.f32 %v1643_v44, 0.0  ;;  %v1933_v44 = vadd.f32 1.0, %v3171_v55 }
 0x4cb   : > { %v3399_v30 = vpop.permute.xlu1 %1971  ;;  %v1947_v48 = vmul.f32 %v1931_v4, %v3166_v54  ;;  %v1491_v54 = vsub.s32 7, %v2849_v25 }
 0x4cc   : > { %v1679_v36 = vmul.f32 %v3189_v6, %v1659_v7  ;;  %v1949_v50 = vmul.f32 %v1933_v44, %v3171_v55  ;;  %v1603_v55 = vmul.f32 %v3176_v58, %v3253_v42 }
 0x4ce   : > { %v1723_v41 = vsel %vm957_vm1, %v1679_v36, 0.0  ;;  %v1935_v36 = vadd.f32 1.0, %v3273_v26 }
 0x4cf   : > { %1724 = vadd.xlane.f32.xlu0 %v1723_v41  ;;  %v3405_v7 = vpop.permute.xlu1 %1975 }
 0x4d0   : > { %v1951_v41 = vmul.f32 %v1935_v36, %v3273_v26  ;;  %v1619_v26 = vadd.f32 %v1603_v55, %v3120_v40 }
 0x4d2   : > { %v2523_v35 = vpop.f32.mrf.mxu1 }
 0x4d3   : > { %v1383_v43 = vadd.f32 %v2523_v35, %v3317_v33  ;;  %v3411_v52 = vpop.permute.xlu1 %1979 }
 0x4d4   : > { %v1374_v47 = vpop.f32.mrf.mxu1 }
 0x4d5   : > { %v1415_v10 = vmax.f32 %v1383_v43, 0.0  ;;  %v1375_v49 = vadd.f32 %v1374_v47, %v3317_v33  ;;  %v3419_v43 = vrot.slane %v3326_v34, %v1491_v54  ;;  %v1639_v34 = vadd.f32 %v3182_v63, %v1619_v26 }
 0x4d6   : > { %v3367_v39 = vpop.f32.mrf.mxu1 }
 0x4d7   : > { %v3370_v51 = vmul.f32 %v3329_v14, %v1415_v10  ;;  %v1413_v24 = vmax.f32 %v1375_v49, 0.0  ;;  %v3415_v35 = vpop.permute.xlu1 %1983  ;;  %v1729_v10 = vadd.f32 %v3311_v12, %v3419_v43  ;;  %v1686_v49 = vpop.xlane.xlu0 %1685  ;;  %v1655_v42 = vmax.f32 %v1639_v34, 0.0 }
 0x4d8   : > { %v3372_v1 = vpop.f32.mrf.mxu1  ;;  %v1734_v40 = vadd.f32 %v3331_v17, %v3419_v43  ;;  %v1742_v22 = vadd.f32 %v3344_v15, %v3419_v43 }
 0x4d9   : > { %v3375_v23 = vmul.f32 %v3329_v14, %v1413_v24  ;;  %v1730_v24 = vadd.f32 %v1686_v49, %v3419_v43 }
 0x4da   : > { %v2527_v53 = vpop.f32.mrf.mxu1  ;;  %v2384_v11 = vmul.f32 -1.442695, %v1734_v40 }
 0x4db   : > { %v1399_v9 = vadd.f32 %v2527_v53, %v3317_v33  ;;  %v3421_v47 = vpop.permute.xlu1 %1987  ;;  %v2379_v53 = vmul.f32 -1.442695, %v1729_v10  ;;  %v2380_v25 = vmul.f32 -1.442695, %v1730_v24 }
 0x4dc   : > { %v1390_v61 = vpop.f32.mrf.mxu1 }
 0x4dd   : > { %v1419_v13 = vmax.f32 %v1399_v9, 0.0  ;;  %v1391_v56 = vadd.f32 %v1390_v61, %v3317_v33  ;;  %2601 = vpow2.f32 %v2379_v53  ;;  %v1732_v61 = vadd.f32 %v3314_v38, %v3419_v43 }
 0x4de   : > { %2603 = vpow2.f32 %v2380_v25 }
 0x4df   : > { %v3380_v16 = vmul.f32 %v3329_v14, %v1419_v13  ;;  %v1417_v27 = vmax.f32 %v1391_v56, 0.0  ;;  %v3429_v9 = vpop.permute.xlu1 %1991  ;;  %v2382_v12 = vmul.f32 -1.442695, %v1732_v61  ;;  %v1689_v61 = vpop.xlane.xlu0 %1688 }
 0x4e1   : > { %v3383_v57 = vmul.f32 %v3329_v14, %v1417_v27  ;;  %v1675_v27 = vmul.f32 %v3189_v6, %v1655_v42  ;;  %2605 = vpow2.f32 %v2382_v12 }
 0x4e2   : > { %2607 = vpow2.f32 %v2384_v11 }
 0x4e3   : > { %v3434_v13 = vpop.permute.xlu1 %1995  ;;  %v1711_v62 = vsel %vm957_vm1, %v1675_v27, 0.0  ;;  %v1695_v12 = vpop.xlane.xlu0 %1694 }
 0x4e5   : > { %1586 = vperm.xlu0 %2551, %v3297_v29  }
 0x4e7   : > { %v3438_v56 = vpop.permute.xlu1 %1999  ;;  %v1701_v11 = vpop.xlane.xlu0 %1700 }
 0x4e9   : > { %1973 = vrot.lane.b32.xlu0 %v1939_v20, %s2725_s14  ;;  %v1736_v20 = vadd.f32 %v3340_v18, %v3419_v43 }
 0x4ea   : > { %v2602_v38 = vpop.eup %2601 }
 0x4eb   : > { %v1793_v17 = vadd.f32 1.0, %v2602_v38  ;;  %v2604_v19 = vpop.eup %2603 }
 0x4ed   : > { %1977 = vrot.lane.b32.xlu0 %v1941_v0, %s2725_s14  ;;  %v2386_v0 = vmul.f32 -1.442695, %v1736_v20  ;;  %v1707_v20 = vpop.xlane.xlu0 %1706 }
 0x4ee   : > { %v2606_v44 = vpop.eup %2605 }
 0x4ef   : > { %2609 = vpow2.f32 %v2386_v0  ;;  %v2608_v36 = vpop.eup %2607  ;;  %v1604_v0 = vmul.f32 %v3176_v58, %v3245_v32 }
 0x4f0   : > { %2611 = vrcp.f32 %v1793_v17 }
 0x4f1   : > { %1981 = vrot.lane.b32.xlu0 %v1943_v28, %s2725_s14  ;;  %v1719_v38 = vpop.xlane.xlu0 %1718 }
 0x4f2   : > { %v1741_v32 = vadd.f32 %v1719_v38, %v3419_v43 }
 0x4f5   : > { %1985 = vrot.lane.b32.xlu0 %v1945_v46, %s2725_s14  ;;  %v2392_v46 = vmul.f32 -1.442695, %v1742_v22 }
 0x4f7   : > { %2613 = vpow2.f32 %v2392_v46 }
 0x4f9   : > { %1989 = vrot.lane.b32.xlu0 %v1947_v48, %s2725_s14  ;;  %v1794_v48 = vadd.f32 1.0, %v2604_v19  ;;  %v1137_v19 = vpop.f32.mrf.mxu0 }
 0x4fa   : > { %v1620_v46 = vadd.f32 %v1604_v0, %v1137_v19 }
 0x4fb   : > { %2615 = vrcp.f32 %v1794_v48  ;;  %v1735_v48 = vadd.f32 %v1701_v11, %v3419_v43 }
 0x4fc   : > { %v2610_v15 = vpop.eup %2609 }
 0x4fd   : > { %1993 = vrot.lane.b32.xlu0 %v1949_v50, %s2725_s14  ;;  %v1796_v50 = vadd.f32 1.0, %v2606_v44  ;;  %v2612_v54 = vpop.eup %2611  ;;  %v1800_v55 = vadd.f32 1.0, %v2610_v15 }
 0x501   : > { %1997 = vrot.lane.b32.xlu0 %v1951_v41, %s2725_s14  ;;  %v1798_v41 = vadd.f32 1.0, %v2608_v36  ;;  %v2385_v36 = vmul.f32 -1.442695, %v1735_v48 }
 0x504   : > { %v2614_v10 = vpop.eup %2613 }
 0x505   : > { %v1806_v26 = vadd.f32 1.0, %v2614_v10  ;;  %v2391_v10 = vmul.f32 -1.442695, %v1741_v32 }
 0x508   : > { %v2616_v49 = vpop.eup %2615 }
 0x518   : > { %v1710_v28 = vpop.xlane.xlu1 %1709 }
 0x519   : > { %v1738_v4 = vadd.f32 %v1710_v28, %v3419_v43  ;;  %v1733_v28 = vadd.f32 %v1695_v12, %v3419_v43 }
 0x51b   : > { %v2388_v18 = vmul.f32 -1.442695, %v1738_v4  ;;  %v2383_v4 = vmul.f32 -1.442695, %v1733_v28 }
 0x51d   : > { %2617 = vpow2.f32 %v2388_v18 }
 0x51e   : > { %2619 = vrcp.f32 %v1796_v50  ;;  %v1640_v50 = vadd.f32 %v3182_v63, %v1620_v46 }
 0x51f   : > { %2621 = vrcp.f32 %v1798_v41 }
 0x520   : > { %1712 = vadd.xlane.f32.xlu0 %v1711_v62  ;;  %2623 = vrcp.f32 %v1800_v55  ;;  %v1731_v62 = vadd.f32 %v1689_v61, %v3419_v43  ;;  %v1737_v55 = vadd.f32 %v1707_v20, %v3419_v43 }
 0x521   : > { %2625 = vrcp.f32 %v1806_v26 }
 0x522   : > { %v2381_v22 = vmul.f32 -1.442695, %v1731_v62 }
 0x52a   : > { %v2618_v24 = vpop.eup %2617 }
 0x52b   : > { %v1802_v53 = vadd.f32 1.0, %v2618_v24  ;;  %v2620_v25 = vpop.eup %2619  ;;  %v2387_v24 = vmul.f32 -1.442695, %v1737_v55  ;;  %v1354_v55 = vadd.f32 %v3342_v31, %v3317_v33 }
 0x52c   : > { %v2622_v34 = vpop.eup %2621 }
 0x52d   : > { %2627 = vrcp.f32 %v1802_v53  ;;  %v2624_v42 = vpop.eup %2623 }
 0x52e   : > { %v2626_v40 = vpop.eup %2625  ;;  %2629 = vpow2.f32 %v2381_v22 }
 0x52f   : > { %2631 = vpow2.f32 %v2383_v4 }
 0x530   : > { %2633 = vpow2.f32 %v2385_v36 }
 0x531   : > { %2635 = vpow2.f32 %v2391_v10  ;;  %v1408_v10 = vmax.f32 %v1354_v55, 0.0 }
 0x532   : > { %2637 = vpow2.f32 %v2387_v24 }
 0x536   : > { %1857 = vrot.lane.b32.xlu0 %v2612_v54, %s2725_s14  ;;  %v1656_v54 = vmax.f32 %v1640_v50, 0.0 }
 0x538   : > { %v1676_v53 = vmul.f32 %v3189_v6, %v1656_v54 }
 0x53a   : > { %1859 = vrot.lane.b32.xlu0 %v2616_v49, %s2725_s14  ;;  %v2628_v27 = vpop.eup %2627 }
 0x53e   : > { %1863 = vrot.lane.b32.xlu0 %v2620_v25, %s2725_s14  ;;  %v2630_v25 = vpop.eup %2629 }
 0x542   : > { %1867 = vrot.lane.b32.xlu0 %v2622_v34, %s2725_s14  ;;  %v1795_v34 = vadd.f32 1.0, %v2630_v25 }
 0x544   : > { %2639 = vrcp.f32 %v1795_v34 }
 0x546   : > { %1871 = vrot.lane.b32.xlu0 %v2624_v42, %s2725_s14 }
 0x54a   : > { %1883 = vrot.lane.b32.xlu0 %v2626_v40, %s2725_s14 }
 0x54e   : > { %1875 = vrot.lane.b32.xlu0 %v2628_v27, %s2725_s14 }
 0x558   : > { %v3458_v17 = vpop.xlane.xlu0 %1724 }
 0x560   : > { %v1587_v18 = vpop.permute.xlu0 %1586 }
 0x561   : > { %v1608_v44 = vmul.f32 %v3176_v58, %v1587_v18 }
 0x563   : > { %v1624_v41 = vadd.f32 %v1608_v44, %v3320_v37  ;;  %v2632_v37 = vpop.eup %2631 }
 0x564   : > { %v1797_v61 = vadd.f32 1.0, %v2632_v37  ;;  %v2634_v42 = vpop.eup %2633 }
 0x565   : > { %v1644_v15 = vadd.f32 %v3182_v63, %v1624_v41  ;;  %v1714_v63 = vsel %vm957_vm1, %v1676_v53, 0.0  ;;  %v1799_v12 = vadd.f32 1.0, %v2634_v42  ;;  %v2636_v40 = vpop.eup %2635  ;;  %v1362_v53 = vadd.f32 %v3363_v8, %v3317_v33 }
 0x566   : > { %2641 = vrcp.f32 %v1797_v61  ;;  %v1805_v27 = vadd.f32 1.0, %v2636_v40  ;;  %v2638_v11 = vpop.eup %2637  ;;  %v1743_v61 = vadd.f32 %v3458_v17, %v3419_v43  ;;  %v1378_v40 = vadd.f32 %v3372_v1, %v3317_v33 }
 0x567   : > { %v1660_v49 = vmax.f32 %v1644_v15, 0.0  ;;  %2643 = vrcp.f32 %v1799_v12  ;;  %v1801_v20 = vadd.f32 1.0, %v2638_v11  ;;  %v2640_v62 = vpop.eup %2639  ;;  %v1410_v31 = vmax.f32 %v1362_v53, 0.0 }
 0x568   : > { %2645 = vrcp.f32 %v1805_v27  ;;  %v2393_v27 = vmul.f32 -1.442695, %v1743_v61 }
 0x569   : > { %v1680_v26 = vmul.f32 %v3189_v6, %v1660_v49  ;;  %v3471_v6 = vpop.permute.xlu0 %1973  ;;  %2647 = vrcp.f32 %v1801_v20  ;;  %v1346_v49 = vadd.f32 %v3346_v21, %v3317_v33  ;;  %v1386_v21 = vadd.f32 %v3367_v39, %v3317_v33  ;;  %v2528_v20 = vpop.f32.mrf.mxu1 }
 0x56a   : > { %v1430_v8 = vmul.f32 %v3329_v14, %v1410_v31  ;;  %v1459_v31 = vsel %vm1030_vm0, %v3353_v3, 0.0  ;;  %v1477_v3 = vsel %vm1030_vm0, %v3383_v57, 0.0 }
 0x56b   : > { %v1726_v58 = vsel %vm957_vm1, %v1680_v26, 0.0  ;;  %v1428_v26 = vmul.f32 %v3329_v14, %v1408_v10  ;;  %v1406_v24 = vmax.f32 %v1346_v49, 0.0  ;;  %v1416_v12 = vmax.f32 %v1386_v21, 0.0 }
 0x56c   : > { %1727 = vadd.xlane.f32.xlu1 %v1726_v58  ;;  %v1370_v58 = vadd.f32 %v3359_v45, %v3317_v33  ;;  %v1456_v17 = vsel %vm1030_vm0, %v1430_v8, 0.0  ;;  %v1453_v21 = vsel %vm1030_vm0, %v3357_v5, 0.0 }
 0x56d   : > { %v3475_v0 = vpop.permute.xlu0 %1977  ;;  %v1426_v25 = vmul.f32 %v3329_v14, %v1406_v24 }
 0x56e   : > { %v1412_v34 = vmax.f32 %v1370_v58, 0.0 }
 0x56f   : > { %v1444_v45 = vsel %vm1030_vm0, %v1426_v25, 0.0 }
 0x570   : > { %1715 = vadd.xlane.f32.xlu1 %v1714_v63  ;;  %v1450_v63 = vsel %vm1030_vm0, %v1428_v26, 0.0  ;;  %v1432_v37 = vmul.f32 %v3329_v14, %v1412_v34 }
 0x571   : > { %v3478_v28 = vpop.permute.xlu0 %1981 }
 0x572   : > { %v1462_v11 = vsel %vm1030_vm0, %v1432_v37, 0.0 }
 0x573   : > { %v2642_v38 = vpop.eup %2641 }
 0x574   : > { %v2644_v22 = vpop.eup %2643 }
 0x575   : > { %v2646_v19 = vpop.eup %2645  ;;  %v3482_v4 = vpop.permute.xlu0 %1985 }
 0x576   : > { %v2648_v46 = vpop.eup %2647 }
 0x579   : > { %v3484_v48 = vpop.permute.xlu0 %1989 }
 0x57d   : > { %v3486_v18 = vpop.permute.xlu0 %1993 }
 0x581   : > { %1861 = vrot.lane.b32.xlu1 %v2640_v62, %s2725_s14  ;;  %v3488_v44 = vpop.permute.xlu0 %1997 }
 0x585   : > { %1865 = vrot.lane.b32.xlu1 %v2642_v38, %s2725_s14  ;;  %v1436_v38 = vmul.f32 %v3329_v14, %v1416_v12 }
 0x589   : > { %1869 = vrot.lane.b32.xlu1 %v2644_v22, %s2725_s14  ;;  %v1414_v22 = vmax.f32 %v1378_v40, 0.0 }
 0x58b   : > { %v1434_v1 = vmul.f32 %v3329_v14, %v1414_v22 }
 0x58d   : > { %1881 = vrot.lane.b32.xlu1 %v2646_v19, %s2725_s14  ;;  %v1402_v19 = vadd.f32 %v2528_v20, %v3317_v33  ;;  %v1468_v55 = vsel %vm1030_vm0, %v1434_v1, 0.0 }
 0x591   : > { %1873 = vrot.lane.b32.xlu1 %v2648_v46, %s2725_s14  ;;  %v1393_v46 = vpop.f32.mrf.mxu1 }
 0x5a9   : > { %v1713_v50 = vpop.xlane.xlu0 %1712 }
 0x5aa   : > { %v1739_v36 = vadd.f32 %v1713_v50, %v3419_v43 }
 0x5ac   : > { %v2389_v32 = vmul.f32 -1.442695, %v1739_v36  ;;  %v1420_v36 = vmax.f32 %v1402_v19, 0.0 }
 0x5ad   : > { %v3550_v40 = vpop.permute.xlu0 %1857 }
 0x5ae   : > { %2649 = vpow2.f32 %v2389_v32  ;;  %v1394_v32 = vadd.f32 %v1393_v46, %v3317_v33 }
 0x5bb   : > { %v2650_v41 = vpop.eup %2649 }
 0x5bc   : > { %v1803_v15 = vadd.f32 1.0, %v2650_v41  ;;  %v1474_v41 = vsel %vm1030_vm0, %v1436_v38, 0.0 }
 0x5be   : > { %2651 = vrcp.f32 %v1803_v15  ;;  %v1440_v15 = vmul.f32 %v3329_v14, %v1420_v36 }
 0x5bf   : > { %2653 = vpow2.f32 %v2393_v27 }
 0x5c0   : > { %v1486_v49 = vsel %vm1030_vm0, %v1440_v15, 0.0 }
 0x5cb   : > { %v2652_v54 = vpop.eup %2651 }
 0x5cc   : > { %1877 = vrot.lane.b32.xlu1 %v2652_v54, %s2725_s14  ;;  %v1418_v54 = vmax.f32 %v1394_v32, 0.0  ;;  %v2654_v26 = vpop.eup %2653 }
 0x5cd   : > { %v1807_v58 = vadd.f32 1.0, %v2654_v26 }
 0x5ce   : > { %v1438_v10 = vmul.f32 %v3329_v14, %v1418_v54  ;;  %v1447_v14 = vsel %vm1030_vm0, %v3335_v59, 0.0  ;;  %v1465_v59 = vsel %vm1030_vm0, %v3375_v23, 0.0 }
 0x5d0   : > { %v1480_v53 = vsel %vm1030_vm0, %v1438_v10, 0.0 }
 0x5f0   : > { %1451 = vadd.xlane.f32.xlu1 %v1450_v63  ;;  %v1441_v63 = vsel %vm1030_vm0, %v3338_v60, 0.0  ;;  %v1483_v60 = vsel %vm1030_vm0, %v3380_v16, 0.0  ;;  %v1860_v16 = vpop.permute.xlu0 %1859 }
 0x5f4   : > { %1445 = vadd.xlane.f32.xlu1 %v1444_v45  ;;  %v1471_v45 = vsel %vm1030_vm0, %v3370_v51, 0.0 }
 0x5f5   : > { %v1728_v42 = vpop.xlane.xlu1 %1727 }
 0x5f6   : > { %v1744_v37 = vadd.f32 %v1728_v42, %v3419_v43 }
 0x5f8   : > { %1463 = vadd.xlane.f32.xlu1 %v1462_v11  ;;  %v2394_v61 = vmul.f32 -1.442695, %v1744_v37  ;;  %v1864_v11 = vpop.permute.xlu0 %1863 }
 0x5f9   : > { %v1716_v62 = vpop.xlane.xlu1 %1715 }
 0x5fa   : > { %v1740_v39 = vadd.f32 %v1716_v62, %v3419_v43 }
 0x5fc   : > { %v2390_v50 = vmul.f32 -1.442695, %v1740_v39  ;;  %1457 = vadd.xlane.f32.xlu1 %v1456_v17  ;;  %v1868_v62 = vpop.permute.xlu0 %1867 }
 0x5fd   : > { %v3544_v42 = vpop.permute.xlu1 %1861 }
 0x5fe   : > { %2655 = vpow2.f32 %v2390_v50 }
 0x600   : > { %1475 = vadd.xlane.f32.xlu1 %v1474_v41  ;;  %v1872_v46 = vpop.permute.xlu0 %1871 }
 0x601   : > { %v3546_v51 = vpop.permute.xlu1 %1865 }
 0x604   : > { %1469 = vadd.xlane.f32.xlu1 %v1468_v55  ;;  %v1884_v41 = vpop.permute.xlu0 %1883 }
 0x605   : > { %v3548_v12 = vpop.permute.xlu1 %1869 }
 0x608   : > { %1487 = vadd.xlane.f32.xlu1 %v1486_v49 }
 0x609   : > { %v3552_v23 = vpop.permute.xlu1 %1881 }
 0x60b   : > { %v2656_v24 = vpop.eup %2655 }
 0x60c   : > { %v1804_v33 = vadd.f32 1.0, %v2656_v24  ;;  %1481 = vadd.xlane.f32.xlu1 %v1480_v53 }
 0x60d   : > { %v3556_v57 = vpop.permute.xlu1 %1873 }
 0x60e   : > { %2657 = vrcp.f32 %v1804_v33 }
 0x60f   : > { %2659 = vrcp.f32 %v1807_v58  ;;  %v1876_v58 = vpop.permute.xlu0 %1875 }
 0x610   : > { %2661 = vpow2.f32 %v2394_v61 }
 0x61b   : > { %v2658_v25 = vpop.eup %2657 }
 0x61c   : > { %v2660_v34 = vpop.eup %2659  ;;  %1879 = vrot.lane.b32.xlu0 %v2658_v25, %s2725_s14 }
 0x61d   : > { %1885 = vrot.lane.b32.xlu1 %v2660_v34, %s2725_s14  ;;  %v2662_v5 = vpop.eup %2661 }
 0x61e   : > { %v1808_v8 = vadd.f32 1.0, %v2662_v5 }
 0x620   : > { %2663 = vrcp.f32 %v1808_v8 }
 0x621   : > { %2665 = vrcp.f32 %v3405_v7 }
 0x622   : > { %2667 = vrcp.f32 %v3399_v30 }
 0x623   : > { %2669 = vrcp.f32 %v3415_v35 }
 0x624   : > { %2671 = vrcp.f32 %v3411_v52 }
 0x625   : > { %2673 = vrcp.f32 %v3429_v9 }
 0x626   : > { %2675 = vrcp.f32 %v3421_v47 }
 0x627   : > { %2677 = vrcp.f32 %v3434_v13 }
 0x628   : > { %2679 = vrcp.f32 %v3471_v6 }
 0x629   : > { %2681 = vrcp.f32 %v3392_v2 }
 0x62a   : > { %2683 = vrcp.f32 %v3478_v28 }
 0x62b   : > { %2685 = vrcp.f32 %v3475_v0 }
 0x62c   : > { %2687 = vrcp.f32 %v3484_v48 }
 0x62d   : > { %v2664_v27 = vpop.eup %2663  ;;  %2689 = vrcp.f32 %v3482_v4 }
 0x62e   : > { %v2666_v22 = vpop.eup %2665  ;;  %2691 = vrcp.f32 %v3486_v18 }
 0x62f   : > { %v2668_v30 = vpop.eup %2667  ;;  %2693 = vrcp.f32 %v3438_v56 }
 0x630   : > { %v2670_v52 = vpop.eup %2669  ;;  %2695 = vrcp.f32 %v3488_v44 }
 0x631   : > { %v2672_v26 = vpop.eup %2671 }
 0x63b   : > { %1448 = vadd.xlane.f32.xlu0 %v1447_v14 }
 0x63e   : > { %v3559_v20 = vpop.permute.xlu1 %1877 }
 0x63f   : > { %1442 = vadd.xlane.f32.xlu0 %v1441_v63  ;;  %v2674_v63 = vpop.eup %2673 }
 0x643   : > { %1460 = vadd.xlane.f32.xlu0 %v1459_v31 }
 0x647   : > { %1454 = vadd.xlane.f32.xlu0 %v1453_v21  ;;  %v2676_v21 = vpop.eup %2675 }
 0x64b   : > { %1472 = vadd.xlane.f32.xlu0 %v1471_v45 }
 0x64f   : > { %1466 = vadd.xlane.f32.xlu0 %v1465_v59 }
 0x653   : > { %1484 = vadd.xlane.f32.xlu0 %v1483_v60  ;;  %v2678_v60 = vpop.eup %2677 }
 0x657   : > { %1478 = vadd.xlane.f32.xlu0 %v1477_v3 }
 0x66d   : > { %1887 = vrot.lane.b32.xlu0 %v2664_v27, %s2725_s14 }
 0x679   : > { %v1452_v39 = vpop.xlane.xlu1 %1451 }
 0x67a   : > { %v1496_v17 = vadd.f32 %v3419_v43, %v1452_v39 }
 0x67c   : > { %v1908_v38 = vmul.f32 %v1864_v11, %v1496_v17 }
 0x67d   : > { %v1446_v19 = vpop.xlane.xlu1 %1445 }
 0x67e   : > { %v2024_v7 = vmul.f32 %v2666_v22, %v1908_v38  ;;  %v1494_v50 = vadd.f32 %v3419_v43, %v1446_v19 }
 0x680   : > { %v1906_v1 = vmul.f32 %v1860_v16, %v1494_v50  ;;  %2066 = vperm.xlu0 %2551, %v2024_v7   ;;  %v2680_v16 = vpop.eup %2679 }
 0x681   : > { %v1464_v36 = vpop.xlane.xlu1 %1463  ;;  %v2682_v2 = vpop.eup %2681 }
 0x682   : > { %v2020_v32 = vmul.f32 %v2668_v30, %v1906_v1  ;;  %v1500_v35 = vadd.f32 %v3419_v43, %v1464_v36 }
 0x684   : > { %v1912_v15 = vmul.f32 %v1872_v46, %v1500_v35  ;;  %2056 = vperm.xlu0 %2551, %v2020_v32  }
 0x685   : > { %v1458_v54 = vpop.xlane.xlu1 %1457 }
 0x686   : > { %v2032_v55 = vmul.f32 %v2670_v52, %v1912_v15  ;;  %v1498_v10 = vadd.f32 %v3419_v43, %v1458_v54 }
 0x688   : > { %v1910_v49 = vmul.f32 %v1868_v62, %v1498_v10  ;;  %2086 = vperm.xlu0 %2551, %v2032_v55  }
 0x689   : > { %v1476_v24 = vpop.xlane.xlu1 %1475 }
 0x68a   : > { %v2028_v53 = vmul.f32 %v2672_v26, %v1910_v49  ;;  %v1504_v9 = vadd.f32 %v3419_v43, %v1476_v24 }
 0x68c   : > { %2076 = vperm.xlu0 %2551, %v2028_v53  }
 0x68d   : > { %v1470_v33 = vpop.xlane.xlu1 %1469 }
 0x68e   : > { %v1502_v25 = vadd.f32 %v3419_v43, %v1470_v33  ;;  %v1880_v34 = vpop.permute.xlu0 %1879  ;;  %v2698_v33 = vld [vmem:[%s2982_s11 + $0x18] sm:$0xff] }
 0x68f   : > { %v1916_v14 = vmul.f32 %v1880_v34, %v1504_v9  ;;  %v2699_v34 = vld [vmem:[%s2982_s11 + $0x8] sm:$0xff] }
 0x690   : > { %v1914_v31 = vmul.f32 %v1876_v58, %v1502_v25 }
 0x691   : > { %v2040_v37 = vmul.f32 %v2674_v63, %v1916_v14  ;;  %v1488_v47 = vpop.xlane.xlu1 %1487 }
 0x692   : > { %v2036_v61 = vmul.f32 %v2676_v21, %v1914_v31  ;;  %v1508_v54 = vadd.f32 %v3419_v43, %v1488_v47  ;;  %v2700_v31 = vld [vmem:[%s2982_s11 + $0x38] sm:$0xff]  ;;  %v2701_v21 = vld [vmem:[%s2982_s11 + $0x28] sm:$0xff] }
 0x693   : > { %2106 = vperm.xlu0 %2551, %v2040_v37  }
 0x695   : > { %v1482_v45 = vpop.xlane.xlu1 %1481 }
 0x696   : > { %v1506_v59 = vadd.f32 %v3419_v43, %v1482_v45 }
 0x697   : > { %2096 = vperm.xlu0 %2551, %v2036_v61  }
 0x698   : > { %v1918_v13 = vmul.f32 %v1884_v41, %v1506_v59  ;;  %v2702_v59 = vld [vmem:[%s2982_s11 + $0x58] sm:$0xff] }
 0x699   : > { %v1886_v10 = vpop.permute.xlu1 %1885 }
 0x69a   : > { %v2044_v3 = vmul.f32 %v2678_v60, %v1918_v13 }
 0x69c   : > { %2116 = vperm.xlu0 %2551, %v2044_v3   ;;  %v2703_v3 = vld [vmem:[%s2982_s11 + $0x48] sm:$0xff] }
 0x6c4   : > { %v1449_v5 = vpop.xlane.xlu0 %1448 }
 0x6c5   : > { %v1495_v8 = vadd.f32 %v3419_v43, %v1449_v5 }
 0x6c7   : > { %v1907_v27 = vmul.f32 %v3544_v42, %v1495_v8  ;;  %v2684_v42 = vpop.eup %2683 }
 0x6c8   : > { %v1443_v11 = vpop.xlane.xlu0 %1442 }
 0x6c9   : > { %v2022_v62 = vmul.f32 %v2680_v16, %v1907_v27  ;;  %v1493_v39 = vadd.f32 %v3419_v43, %v1443_v11  ;;  %v2704_v27 = vld [vmem:[%s2982_s11 + $0x68] sm:$0xff] }
 0x6cb   : > { %v1905_v6 = vmul.f32 %v3550_v40, %v1493_v39  ;;  %2061 = vperm.xlu1 %2552, %v2022_v62   ;;  %v2686_v40 = vpop.eup %2685  ;;  %v2705_v62 = vld [vmem:[%s2982_s11 + $0x10] sm:$0xff] }
 0x6cc   : > { %v1461_v17 = vpop.xlane.xlu0 %1460 }
 0x6cd   : > { %v2018_v28 = vmul.f32 %v2682_v2, %v1905_v6  ;;  %v1499_v38 = vadd.f32 %v3419_v43, %v1461_v17  ;;  %v2706_v2 = vld [vmem:[%s2982_s11] sm:$0xff] }
 0x6cf   : > { %v1911_v0 = vmul.f32 %v3548_v12, %v1499_v38  ;;  %2051 = vperm.xlu1 %2552, %v2018_v28   ;;  %v2688_v12 = vpop.eup %2687  ;;  %v2707_v38 = vld [vmem:[%s2982_s11 + $0x30] sm:$0xff] }
 0x6d0   : > { %v1455_v22 = vpop.xlane.xlu0 %1454  ;;  %v2690_v35 = vpop.eup %2689 }
 0x6d1   : > { %v2030_v19 = vmul.f32 %v2684_v42, %v1911_v0  ;;  %v1497_v46 = vadd.f32 %v3419_v43, %v1455_v22  ;;  %v2692_v55 = vpop.eup %2691  ;;  %v2708_v22 = vld [vmem:[%s2982_s11 + $0x20] sm:$0xff] }
 0x6d2   : > { %v2694_v24 = vpop.eup %2693 }
 0x6d3   : > { %v1909_v48 = vmul.f32 %v3546_v51, %v1497_v46  ;;  %2081 = vperm.xlu1 %2552, %v2030_v19   ;;  %v2696_v53 = vpop.eup %2695 }
 0x6d4   : > { %v1473_v7 = vpop.xlane.xlu0 %1472 }
 0x6d5   : > { %v2026_v50 = vmul.f32 %v2686_v40, %v1909_v48  ;;  %v1503_v1 = vadd.f32 %v3419_v43, %v1473_v7  ;;  %v2709_v48 = vld [vmem:[%s2982_s11 + $0x50] sm:$0xff] }
 0x6d7   : > { %v1915_v4 = vmul.f32 %v3559_v20, %v1503_v1  ;;  %2071 = vperm.xlu1 %2552, %v2026_v50   ;;  %v2710_v50 = vld [vmem:[%s2982_s11 + $0x40] sm:$0xff] }
 0x6d8   : > { %v1467_v30 = vpop.xlane.xlu0 %1466 }
 0x6d9   : > { %v2038_v36 = vmul.f32 %v2688_v12, %v1915_v4  ;;  %v1501_v32 = vadd.f32 %v3419_v43, %v1467_v30  ;;  %v2711_v12 = vld [vmem:[%s2982_s11 + $0x60] sm:$0xff] }
 0x6db   : > { %v1913_v51 = vmul.f32 %v3556_v57, %v1501_v32  ;;  %2101 = vperm.xlu1 %2552, %v2038_v36  }
 0x6dc   : > { %v1485_v41 = vpop.xlane.xlu0 %1484 }
 0x6dd   : > { %v2034_v15 = vmul.f32 %v2690_v35, %v1913_v51  ;;  %v1507_v20 = vadd.f32 %v3419_v43, %v1485_v41  ;;  %v2712_v35 = vld [vmem:[%s2982_s11 + $0x70] sm:$0xff] }
 0x6df   : > { %2091 = vperm.xlu1 %2552, %v2034_v15   ;;  %v1919_v49 = vmul.f32 %v1886_v10, %v1507_v20 }
 0x6e0   : > { %v1479_v18 = vpop.xlane.xlu0 %1478 }
 0x6e1   : > { %v1505_v52 = vadd.f32 %v3419_v43, %v1479_v18  ;;  %v2046_v9 = vmul.f32 %v2696_v53, %v1919_v49 }
 0x6e3   : > { %v1917_v56 = vmul.f32 %v3552_v23, %v1505_v52 }
 0x6e4   : > { %v1888_v44 = vpop.permute.xlu0 %1887 }
 0x6e5   : > { %v2042_v57 = vmul.f32 %v2692_v55, %v1917_v56  ;;  %v1920_v26 = vmul.f32 %v1888_v44, %v1508_v54 }
 0x6e7   : > { %v2048_v58 = vmul.f32 %v2694_v24, %v1920_v26  ;;  %2111 = vperm.xlu1 %2552, %v2042_v57  }
 0x6e9   : > { %2126 = vperm.xlu0 %2551, %v2048_v58  }
 0x6eb   : > { %2121 = vperm.xlu1 %2552, %v2046_v9  }
 0x6fb   : > { %v2067_v43 = vpop.permute.xlu0 %2066 }
 0x6fc   : > { %v2132_v25 = vmul.f32 %v2698_v33, %v2067_v43 }
 0x6fe   : > { %2167 = vrot.lane.b32.xlu0 %v2132_v25, %s2726_s25 }
 0x6ff   : > { %v2057_v23 = vpop.permute.xlu0 %2056 }
 0x700   : > { %v2130_v14 = vmul.f32 %v2699_v34, %v2057_v23 }
 0x702   : > { %2163 = vrot.lane.b32.xlu0 %v2130_v14, %s2726_s25 }
 0x703   : > { %v2087_v63 = vpop.permute.xlu0 %2086 }
 0x704   : > { %v2136_v37 = vmul.f32 %v2700_v31, %v2087_v63 }
 0x706   : > { %2175 = vrot.lane.b32.xlu0 %v2136_v37, %s2726_s25 }
 0x707   : > { %v2077_v47 = vpop.permute.xlu0 %2076 }
 0x708   : > { %v2134_v61 = vmul.f32 %v2701_v21, %v2077_v47 }
 0x70a   : > { %2171 = vrot.lane.b32.xlu0 %v2134_v61, %s2726_s25 }
 0x70e   : > { %v2107_v45 = vpop.permute.xlu0 %2106 }
 0x70f   : > { %v2140_v13 = vmul.f32 %v2702_v59, %v2107_v45 }
 0x711   : > { %2183 = vrot.lane.b32.xlu0 %v2140_v13, %s2726_s25 }
 0x712   : > { %v2097_v60 = vpop.permute.xlu0 %2096 }
 0x713   : > { %v2138_v5 = vmul.f32 %v2703_v3, %v2097_v60 }
 0x715   : > { %2179 = vrot.lane.b32.xlu0 %v2138_v5, %s2726_s25 }
 0x717   : > { %v2117_v8 = vpop.permute.xlu0 %2116 }
 0x718   : > { %v2142_v16 = vmul.f32 %v2704_v27, %v2117_v8 }
 0x71a   : > { %2187 = vrot.lane.b32.xlu0 %v2142_v16, %s2726_s25 }
 0x746   : > { %v2062_v11 = vpop.permute.xlu1 %2061 }
 0x747   : > { %v2131_v39 = vmul.f32 %v2705_v62, %v2062_v11 }
 0x749   : > { %2165 = vrot.lane.b32.xlu1 %v2131_v39, %s2726_s25 }
 0x74a   : > { %v2052_v6 = vpop.permute.xlu1 %2051 }
 0x74b   : > { %v2129_v17 = vmul.f32 %v2706_v2, %v2052_v6 }
 0x74d   : > { %2161 = vrot.lane.b32.xlu1 %v2129_v17, %s2726_s25 }
 0x74e   : > { %v2082_v28 = vpop.permute.xlu1 %2081 }
 0x74f   : > { %v2135_v0 = vmul.f32 %v2707_v38, %v2082_v28 }
 0x751   : > { %2173 = vrot.lane.b32.xlu1 %v2135_v0, %s2726_s25 }
 0x752   : > { %v2072_v42 = vpop.permute.xlu1 %2071 }
 0x753   : > { %v2133_v19 = vmul.f32 %v2708_v22, %v2072_v42 }
 0x755   : > { %2169 = vrot.lane.b32.xlu1 %v2133_v19, %s2726_s25 }
 0x756   : > { %v2102_v46 = vpop.permute.xlu1 %2101 }
 0x757   : > { %v2139_v40 = vmul.f32 %v2709_v48, %v2102_v46 }
 0x759   : > { %2181 = vrot.lane.b32.xlu1 %v2139_v40, %s2726_s25 }
 0x75a   : > { %v2092_v7 = vpop.permute.xlu1 %2091 }
 0x75b   : > { %v2137_v1 = vmul.f32 %v2710_v50, %v2092_v7 }
 0x75d   : > { %2177 = vrot.lane.b32.xlu1 %v2137_v1, %s2726_s25 }
 0x762   : > { %v2112_v4 = vpop.permute.xlu1 %2111 }
 0x763   : > { %v2141_v30 = vmul.f32 %v2711_v12, %v2112_v4 }
 0x764   : > { %v2127_v36 = vpop.permute.xlu0 %2126 }
 0x765   : > { %v2144_v32 = vmul.f32 %v2127_v36, %v3297_v29  ;;  %2185 = vrot.lane.b32.xlu1 %v2141_v30, %s2726_s25 }
 0x766   : > { %v2122_v51 = vpop.permute.xlu1 %2121 }
 0x767   : > { %v2143_v41 = vmul.f32 %v2712_v35, %v2122_v51  ;;  %2191 = vrot.lane.b32.xlu0 %v2144_v32, %s2726_s25 }
 0x769   : > { %2189 = vrot.lane.b32.xlu1 %v2143_v41, %s2726_s25 }
 0x770   : > { %v2168_v29 = vpop.permute.xlu0 %2167 }
 0x771   : > { %2213 = vst.msk [vmem:[%s3635_s17 + $0x18] sm:$0xff] %vm2209_vm2, %v2168_v29 }
 0x774   : > { %v2164_v15 = vpop.permute.xlu0 %2163 }
 0x775   : > { %2211 = vst.msk [vmem:[%s3635_s17 + $0x8] sm:$0xff] %vm2209_vm2, %v2164_v15 }
 0x778   : > { %v2176_v18 = vpop.permute.xlu0 %2175 }
 0x779   : > { %2217 = vst.msk [vmem:[%s3635_s17 + $0x38] sm:$0xff] %vm2209_vm2, %v2176_v18 }
 0x77c   : > { %v2172_v20 = vpop.permute.xlu0 %2171 }
 0x77d   : > { %2215 = vst.msk [vmem:[%s3635_s17 + $0x28] sm:$0xff] %vm2209_vm2, %v2172_v20 }
 0x783   : > { %v2184_v52 = vpop.permute.xlu0 %2183 }
 0x784   : > { %2221 = vst.msk [vmem:[%s3635_s17 + $0x58] sm:$0xff] %vm2209_vm2, %v2184_v52 }
 0x787   : > { %v2180_v54 = vpop.permute.xlu0 %2179 }
 0x788   : > { %2219 = vst.msk [vmem:[%s3635_s17 + $0x48] sm:$0xff] %vm2209_vm2, %v2180_v54 }
 0x78c   : > { %v2188_v56 = vpop.permute.xlu0 %2187 }
 0x78d   : > { %2223 = vst.msk [vmem:[%s3635_s17 + $0x68] sm:$0xff] %vm2209_vm2, %v2188_v56 }
 0x7bb   : > { %v2166_v55 = vpop.permute.xlu1 %2165 }
 0x7bc   : > { %2212 = vst.msk [vmem:[%s3635_s17 + $0x10] sm:$0xff] %vm2209_vm2, %v2166_v55 }
 0x7bf   : > { %v2162_v10 = vpop.permute.xlu1 %2161 }
 0x7c0   : > { %2210 = vst.msk [vmem:[%s3635_s17] sm:$0xff] %vm2209_vm2, %v2162_v10 }
 0x7c3   : > { %v2174_v44 = vpop.permute.xlu1 %2173 }
 0x7c4   : > { %2216 = vst.msk [vmem:[%s3635_s17 + $0x30] sm:$0xff] %vm2209_vm2, %v2174_v44 }
 0x7c7   : > { %v2170_v49 = vpop.permute.xlu1 %2169 }
 0x7c8   : > { %2214 = vst.msk [vmem:[%s3635_s17 + $0x20] sm:$0xff] %vm2209_vm2, %v2170_v49 }
 0x7cb   : > { %v2182_v57 = vpop.permute.xlu1 %2181 }
 0x7cc   : > { %2220 = vst.msk [vmem:[%s3635_s17 + $0x50] sm:$0xff] %vm2209_vm2, %v2182_v57 }
 0x7cf   : > { %v2178_v26 = vpop.permute.xlu1 %2177 }
 0x7d0   : > { %2218 = vst.msk [vmem:[%s3635_s17 + $0x40] sm:$0xff] %vm2209_vm2, %v2178_v26 }
 0x7d7   : > { %v2186_v24 = vpop.permute.xlu1 %2185 }
 0x7d8   : > { %2222 = vst.msk [vmem:[%s3635_s17 + $0x60] sm:$0xff] %vm2209_vm2, %v2186_v24 }
 0x7d9   : > { %v2192_v58 = vpop.permute.xlu0 %2191 }
 0x7da   : > { %2225 = vst.msk [vmem:[%s3635_s17 + $0x78] sm:$0xff] %vm2209_vm2, %v2192_v58 }
 0x7db   : > { %v2190_v53 = vpop.permute.xlu1 %2189 }
 0x7dc   : > { %2224 = vst.msk [vmem:[%s3635_s17 + $0x70] sm:$0xff] %vm2209_vm2, %v2190_v53 }
 0x7dd PF: > { %s18_s27 = sadd.s32 1, %s2719_s27  }
 0x7de   : > { %p15_p4 = scmp.ge.s32.totalorder %s18_s27, 6  }
 0x7e0   :  { %17 = sbr.rel (!%p15_p4) target bundleno = 1 (0x1), region = 88 }

</bundles_post_ra>
